<compile_context>
chip_gen: v7x
topology: tpu7x:2x2x1
jax: 0.10.0
libtpu: 0.0.40
codegen_flags: <defaults>
</compile_context>

<pallas_src>
import jax
import jax.numpy as jnp
from jax import lax
from jax.experimental import pallas as pl
from jax.experimental.pallas import tpu as pltpu


def _round_up(n, m):
    return ((n + m - 1) // m) * m


def _gru_tagger_kernel(x_ref, len_ref,
                       w_ir_ref, w_iz_ref, w_in_ref,
                       w_hr_ref, w_hz_ref, w_hn_ref,
                       b_r_ref, b_z_ref, b_in_ref, b_hn_ref,
                       w_out_ref, b_out_ref,
                       tags_ref,
                       gr_scr, gz_scr, gn_scr):
    T, b_blk, E = x_ref.shape
    H = w_hr_ref.shape[0]

    # ---- Hoisted input projection: one big matmul per gate for ALL timesteps.
    # x_ref is bf16 (T, b_blk, E); collapse leading dims (keeps minor dim).
    x2d = x_ref[...].reshape(T * b_blk, E)
    gr_scr[...] = (jnp.dot(x2d, w_ir_ref[...], preferred_element_type=jnp.float32)
                   + b_r_ref[...])          # b_ih_r + b_hh_r folded in wrapper
    gz_scr[...] = (jnp.dot(x2d, w_iz_ref[...], preferred_element_type=jnp.float32)
                   + b_z_ref[...])          # b_ih_z + b_hh_z folded in wrapper
    gn_scr[...] = (jnp.dot(x2d, w_in_ref[...], preferred_element_type=jnp.float32)
                   + b_in_ref[...])         # b_ih_n only (b_hh_n sits inside r*(...))

    lens = len_ref[...]                                      # (b_blk, 1) int32
    b_hn = jnp.broadcast_to(b_hn_ref[...], (b_blk, H))       # hoisted broadcast

    def step(t, h):
        off = pl.multiple_of(t * b_blk, b_blk)
        gi_r = gr_scr[pl.ds(off, b_blk), :]
        gi_z = gz_scr[pl.ds(off, b_blk), :]
        gi_n = gn_scr[pl.ds(off, b_blk), :]

        # Only the h-recurrence matmuls remain on the serial critical path.
        h_b = h.astype(jnp.bfloat16)
        gh_r = jnp.dot(h_b, w_hr_ref[...], preferred_element_type=jnp.float32)
        gh_z = jnp.dot(h_b, w_hz_ref[...], preferred_element_type=jnp.float32)
        gh_n = jnp.dot(h_b, w_hn_ref[...], preferred_element_type=jnp.float32) + b_hn

        # Gate elementwise math in f32 (v5e has no bf16 VPU/EUP path).
        r = jax.nn.sigmoid(gi_r + gh_r)
        z = jax.nn.sigmoid(gi_z + gh_z)
        n = jnp.tanh(gi_n + r * gh_n)
        h_new = n + z * (h - n)                 # == (1-z)*n + z*h

        # Freeze hidden state once a sequence has ended (packed-sequence gather).
        return jnp.where(t < lens, h_new, h)

    h0 = jnp.zeros((b_blk, H), jnp.float32)
    # Small fixed T -> fully unroll for LLO scheduling visibility.
    h_last = lax.fori_loop(0, T, step, h0, unroll=True)

    # Final Linear epilogue (runs once per batch block, not per timestep).
    tags_ref[...] = (jnp.dot(h_last.astype(jnp.bfloat16), w_out_ref[...],
                             preferred_element_type=jnp.float32)
                     + b_out_ref[...])


def gru_tagger_forward(x_bte, lengths, params):
    """x_bte: (B, T, E) padded batch-first input; lengths: (B,) int32.

    params are PyTorch-native GRU/Linear parameters:
      weight_ih (3H, E), weight_hh (3H, H), bias_ih (3H,), bias_hh (3H,),
      w_out (O, H), b_out (O,)   with gate row order [r | z | n].
    """
    w_ih, w_hh, b_ih, b_hh, w_out, b_out = params
    B, T, E = x_bte.shape
    H = w_hh.shape[1]
    O = w_out.shape[0]

    # --- batch padding: sublane-align (>=8) and tile large batches over a
    #     "parallel" grid axis so v7x's two TensorCores each take half.
    B_BLOCK_MAX = 128
    if B <= B_BLOCK_MAX:
        b_blk = _round_up(B, 8)
        b_pad = b_blk
    else:
        b_blk = B_BLOCK_MAX
        b_pad = _round_up(B, B_BLOCK_MAX)
    num_blocks = b_pad // b_blk

    x_tbe = jnp.transpose(x_bte, (1, 0, 2))                  # (T, B, E) time-major
    lengths = lengths.astype(jnp.int32)
    if b_pad != B:
        x_tbe = jnp.pad(x_tbe, ((0, 0), (0, b_pad - B), (0, 0)))
        lengths = jnp.pad(lengths, (0, b_pad - B))           # len 0 -> h stays 0
    x_tbe = x_tbe.astype(jnp.bfloat16)                       # half the x DMA bytes
    len_col = lengths.reshape(b_pad, 1)

    # --- gate-major weight layout (avoid lane-slicing of 3H-wide activations).
    w_ir = w_ih[0 * H:1 * H].T.astype(jnp.bfloat16)          # (E, H)
    w_iz = w_ih[1 * H:2 * H].T.astype(jnp.bfloat16)
    w_in = w_ih[2 * H:3 * H].T.astype(jnp.bfloat16)
    w_hr = w_hh[0 * H:1 * H].T.astype(jnp.bfloat16)          # (H, H)
    w_hz = w_hh[1 * H:2 * H].T.astype(jnp.bfloat16)
    w_hn = w_hh[2 * H:3 * H].T.astype(jnp.bfloat16)
    b_r = (b_ih[0 * H:1 * H] + b_hh[0 * H:1 * H]).reshape(1, H).astype(jnp.float32)
    b_z = (b_ih[1 * H:2 * H] + b_hh[1 * H:2 * H]).reshape(1, H).astype(jnp.float32)
    b_in = b_ih[2 * H:3 * H].reshape(1, H).astype(jnp.float32)
    b_hn = b_hh[2 * H:3 * H].reshape(1, H).astype(jnp.float32)
    w_o = w_out.T.astype(jnp.bfloat16)                       # (H, O)
    b_o = b_out.reshape(1, O).astype(jnp.float32)

    rep = lambda i: (0, 0)                                   # weights resident
    grid_spec = pltpu.PrefetchScalarGridSpec(
        num_scalar_prefetch=0,
        grid=(num_blocks,),                                  # batch blocks only
        in_specs=[
            pl.BlockSpec((T, b_blk, E), lambda i: (0, i, 0)),   # x batch block
            pl.BlockSpec((b_blk, 1), lambda i: (i, 0)),         # lengths
            pl.BlockSpec((E, H), rep), pl.BlockSpec((E, H), rep), pl.BlockSpec((E, H), rep),
            pl.BlockSpec((H, H), rep), pl.BlockSpec((H, H), rep), pl.BlockSpec((H, H), rep),
            pl.BlockSpec((1, H), rep), pl.BlockSpec((1, H), rep), pl.BlockSpec((1, H), rep),
            pl.BlockSpec((1, H), rep),
            pl.BlockSpec((H, O), rep), pl.BlockSpec((1, O), rep),
        ],
        out_specs=pl.BlockSpec((b_blk, O), lambda i: (i, 0)),
        scratch_shapes=[
            pltpu.VMEM((T * b_blk, H), jnp.float32),          # gi_r for all t
            pltpu.VMEM((T * b_blk, H), jnp.float32),          # gi_z for all t
            pltpu.VMEM((T * b_blk, H), jnp.float32),          # gi_n for all t
        ],
    )

    tags = pl.pallas_call(
        _gru_tagger_kernel,
        out_shape=jax.ShapeDtypeStruct((b_pad, O), jnp.float32),
        grid_spec=grid_spec,
        compiler_params=pltpu.CompilerParams(
            dimension_semantics=("parallel",)),               # batch blocks independent
    )(x_tbe, len_col, w_ir, w_iz, w_in, w_hr, w_hz, w_hn,
      b_r, b_z, b_in, b_hn, w_o, b_o)

    return tags[:B]


def gru_tagger_reference(x_bte, lengths, params):
    """Pure-JAX reference mirroring torch.nn.GRU + last-valid-step gather + Linear.

    Matmul inputs are cast to bf16 (f32 accumulation) to mirror the kernel's MXU
    precision choice; gate math and state are f32.
    """
    w_ih, w_hh, b_ih, b_hh, w_out, b_out = params
    B, T, E = x_bte.shape
    H = w_hh.shape[1]
    xb = x_bte.astype(jnp.bfloat16)
    wih_t = w_ih.T.astype(jnp.bfloat16)      # (E, 3H)
    whh_t = w_hh.T.astype(jnp.bfloat16)      # (H, 3H)
    h = jnp.zeros((B, H), jnp.float32)
    for t in range(T):
        gi = jnp.dot(xb[:, t, :], wih_t, preferred_element_type=jnp.float32) + b_ih
        gh = jnp.dot(h.astype(jnp.bfloat16), whh_t, preferred_element_type=jnp.float32) + b_hh
        r = jax.nn.sigmoid(gi[:, :H] + gh[:, :H])
        z = jax.nn.sigmoid(gi[:, H:2 * H] + gh[:, H:2 * H])
        n = jnp.tanh(gi[:, 2 * H:] + r * gh[:, 2 * H:])
        h_new = (1.0 - z) * n + z * h
        m = (t < lengths)[:, None]
        h = jnp.where(m, h_new, h)
    return (jnp.dot(h.astype(jnp.bfloat16), w_out.T.astype(jnp.bfloat16),
                    preferred_element_type=jnp.float32) + b_out)


if __name__ == "__main__":
    # Small, deterministic shapes consistent with the module's forward
    # (embedding_dim=16, hidden_dim=32, output_size=1; no Embedding layer).
    B, T, E, H, O = 4, 8, 16, 32, 1

    key = jax.random.PRNGKey(0)
    k_x, k1, k2, k3, k4, k5, k6 = jax.random.split(key, 7)

    bound = 1.0 / (H ** 0.5)  # PyTorch-style uniform init range
    # PyTorch-native parameter shapes, gate row order [r | z | n].
    w_ih = jax.random.uniform(k1, (3 * H, E), jnp.float32, -bound, bound)
    w_hh = jax.random.uniform(k2, (3 * H, H), jnp.float32, -bound, bound)
    b_ih = jax.random.uniform(k3, (3 * H,), jnp.float32, -bound, bound)
    b_hh = jax.random.uniform(k4, (3 * H,), jnp.float32, -bound, bound)
    w_out = jax.random.uniform(k5, (O, H), jnp.float32, -bound, bound)
    b_out = jax.random.uniform(k6, (O,), jnp.float32, -bound, bound)
    params = (w_ih, w_hh, b_ih, b_hh, w_out, b_out)

    x = jax.random.normal(k_x, (B, T, E), jnp.float32)        # padded batch-first input
    lengths = jnp.array([8, 5, 3, 7], dtype=jnp.int32)         # per-sequence valid lengths

    tags = gru_tagger_forward(x, lengths, params)
    tags = jax.block_until_ready(tags)

    ref = gru_tagger_reference(x, lengths, params)
    assert tags.shape == (B, O)
    assert jnp.allclose(tags, ref, atol=1e-3, rtol=1e-3), "mismatch vs reference"

    print("KERNEL_OK")
</pallas_src>

<mosaic_0001>
module attributes {stable_mosaic.version = 11 : i64} {
  func.func @_gru_tagger_kernel(%arg0: i32, %arg1: memref<8x8x16xbf16, #tpu.memory_space<vmem>>, %arg2: memref<8x1xi32, #tpu.memory_space<vmem>>, %arg3: memref<16x32xbf16, #tpu.memory_space<vmem>>, %arg4: memref<16x32xbf16, #tpu.memory_space<vmem>>, %arg5: memref<16x32xbf16, #tpu.memory_space<vmem>>, %arg6: memref<32x32xbf16, #tpu.memory_space<vmem>>, %arg7: memref<32x32xbf16, #tpu.memory_space<vmem>>, %arg8: memref<32x32xbf16, #tpu.memory_space<vmem>>, %arg9: memref<1x32xf32, #tpu.memory_space<vmem>>, %arg10: memref<1x32xf32, #tpu.memory_space<vmem>>, %arg11: memref<1x32xf32, #tpu.memory_space<vmem>>, %arg12: memref<1x32xf32, #tpu.memory_space<vmem>>, %arg13: memref<32x1xbf16, #tpu.memory_space<vmem>>, %arg14: memref<1x1xf32, #tpu.memory_space<vmem>>, %arg15: memref<8x1xf32, #tpu.memory_space<vmem>>, %arg16: memref<64x32xf32, #tpu.memory_space<vmem>>, %arg17: memref<64x32xf32, #tpu.memory_space<vmem>>, %arg18: memref<64x32xf32, #tpu.memory_space<vmem>>) attributes {dimension_semantics = [#tpu.dimension_semantics<parallel>], iteration_bounds = array<i64: 1>, scalar_prefetch = 0 : i64, scratch_operands = 3 : i64, tpu.core_type = #tpu.core_type<tc>, window_params = [{transform_indices = @transform_0, window_bounds = array<i64: 8, 8, 16>}, {transform_indices = @transform_1, window_bounds = array<i64: 8, 1>}, {pipeline_mode = #tpu.pipeline_mode<synchronous>, transform_indices = @transform_2, window_bounds = array<i64: 16, 32>}, {pipeline_mode = #tpu.pipeline_mode<synchronous>, transform_indices = @transform_3, window_bounds = array<i64: 16, 32>}, {pipeline_mode = #tpu.pipeline_mode<synchronous>, transform_indices = @transform_4, window_bounds = array<i64: 16, 32>}, {pipeline_mode = #tpu.pipeline_mode<synchronous>, transform_indices = @transform_5, window_bounds = array<i64: 32, 32>}, {pipeline_mode = #tpu.pipeline_mode<synchronous>, transform_indices = @transform_6, window_bounds = array<i64: 32, 32>}, {pipeline_mode = #tpu.pipeline_mode<synchronous>, transform_indices = @transform_7, window_bounds = array<i64: 32, 32>}, {pipeline_mode = #tpu.pipeline_mode<synchronous>, transform_indices = @transform_8, window_bounds = array<i64: 1, 32>}, {pipeline_mode = #tpu.pipeline_mode<synchronous>, transform_indices = @transform_9, window_bounds = array<i64: 1, 32>}, {pipeline_mode = #tpu.pipeline_mode<synchronous>, transform_indices = @transform_10, window_bounds = array<i64: 1, 32>}, {pipeline_mode = #tpu.pipeline_mode<synchronous>, transform_indices = @transform_11, window_bounds = array<i64: 1, 32>}, {pipeline_mode = #tpu.pipeline_mode<synchronous>, transform_indices = @transform_12, window_bounds = array<i64: 32, 1>}, {pipeline_mode = #tpu.pipeline_mode<synchronous>, transform_indices = @transform_13, window_bounds = array<i64: 1, 1>}, {transform_indices = @transform_14, window_bounds = array<i64: 8, 1>}]} {
    %c0 = arith.constant 0 : index
    %c0_0 = arith.constant 0 : index
    %c0_1 = arith.constant 0 : index
    %0 = vector.load %arg1[%c0, %c0_0, %c0_1] : memref<8x8x16xbf16, #tpu.memory_space<vmem>>, vector<8x8x16xbf16>
    %1 = vector.shape_cast %0 : vector<8x8x16xbf16> to vector<64x16xbf16>
    %c0_2 = arith.constant 0 : index
    %c0_3 = arith.constant 0 : index
    %2 = vector.load %arg3[%c0_2, %c0_3] : memref<16x32xbf16, #tpu.memory_space<vmem>>, vector<16x32xbf16>
    %cst = arith.constant dense<0.000000e+00> : vector<64x32xf32>
    %3 = tpu.matmul %1, %2, %cst {dimension_numbers = #tpu.dot_dimension_numbers<[1], [0], [0], [1], [0, 0, 1, 1], [], []>} : vector<64x16xbf16>, vector<16x32xbf16>, vector<64x32xf32> -> vector<64x32xf32>
    %c0_4 = arith.constant 0 : index
    %c0_5 = arith.constant 0 : index
    %4 = vector.load %arg9[%c0_4, %c0_5] : memref<1x32xf32, #tpu.memory_space<vmem>>, vector<1x32xf32>
    %5 = vector.broadcast %4 : vector<1x32xf32> to vector<64x32xf32>
    %6 = arith.addf %3, %5 : vector<64x32xf32>
    %c0_6 = arith.constant 0 : index
    %c0_7 = arith.constant 0 : index
    %7 = vector.load %arg16[%c0_6, %c0_7] : memref<64x32xf32, #tpu.memory_space<vmem>>, vector<64x32xf32>
    tpu.vector_store %arg16[%c0_6, %c0_7], %6 {strides = array<i32>} : memref<64x32xf32, #tpu.memory_space<vmem>>, vector<64x32xf32>,
    %c0_8 = arith.constant 0 : index
    %c0_9 = arith.constant 0 : index
    %8 = vector.load %arg4[%c0_8, %c0_9] : memref<16x32xbf16, #tpu.memory_space<vmem>>, vector<16x32xbf16>
    %cst_10 = arith.constant dense<0.000000e+00> : vector<64x32xf32>
    %9 = tpu.matmul %1, %8, %cst_10 {dimension_numbers = #tpu.dot_dimension_numbers<[1], [0], [0], [1], [0, 0, 1, 1], [], []>} : vector<64x16xbf16>, vector<16x32xbf16>, vector<64x32xf32> -> vector<64x32xf32>
    %c0_11 = arith.constant 0 : index
    %c0_12 = arith.constant 0 : index
    %10 = vector.load %arg10[%c0_11, %c0_12] : memref<1x32xf32, #tpu.memory_space<vmem>>, vector<1x32xf32>
    %11 = vector.broadcast %10 : vector<1x32xf32> to vector<64x32xf32>
    %12 = arith.addf %9, %11 : vector<64x32xf32>
    %c0_13 = arith.constant 0 : index
    %c0_14 = arith.constant 0 : index
    %13 = vector.load %arg17[%c0_13, %c0_14] : memref<64x32xf32, #tpu.memory_space<vmem>>, vector<64x32xf32>
    tpu.vector_store %arg17[%c0_13, %c0_14], %12 {strides = array<i32>} : memref<64x32xf32, #tpu.memory_space<vmem>>, vector<64x32xf32>,
    %c0_15 = arith.constant 0 : index
    %c0_16 = arith.constant 0 : index
    %14 = vector.load %arg5[%c0_15, %c0_16] : memref<16x32xbf16, #tpu.memory_space<vmem>>, vector<16x32xbf16>
    %cst_17 = arith.constant dense<0.000000e+00> : vector<64x32xf32>
    %15 = tpu.matmul %1, %14, %cst_17 {dimension_numbers = #tpu.dot_dimension_numbers<[1], [0], [0], [1], [0, 0, 1, 1], [], []>} : vector<64x16xbf16>, vector<16x32xbf16>, vector<64x32xf32> -> vector<64x32xf32>
    %c0_18 = arith.constant 0 : index
    %c0_19 = arith.constant 0 : index
    %16 = vector.load %arg11[%c0_18, %c0_19] : memref<1x32xf32, #tpu.memory_space<vmem>>, vector<1x32xf32>
    %17 = vector.broadcast %16 : vector<1x32xf32> to vector<64x32xf32>
    %18 = arith.addf %15, %17 : vector<64x32xf32>
    %c0_20 = arith.constant 0 : index
    %c0_21 = arith.constant 0 : index
    %19 = vector.load %arg18[%c0_20, %c0_21] : memref<64x32xf32, #tpu.memory_space<vmem>>, vector<64x32xf32>
    tpu.vector_store %arg18[%c0_20, %c0_21], %18 {strides = array<i32>} : memref<64x32xf32, #tpu.memory_space<vmem>>, vector<64x32xf32>,
    %c0_22 = arith.constant 0 : index
    %c0_23 = arith.constant 0 : index
    %20 = vector.load %arg2[%c0_22, %c0_23] : memref<8x1xi32, #tpu.memory_space<vmem>>, vector<8x1xi32>
    %c0_24 = arith.constant 0 : index
    %c0_25 = arith.constant 0 : index
    %21 = vector.load %arg12[%c0_24, %c0_25] : memref<1x32xf32, #tpu.memory_space<vmem>>, vector<1x32xf32>
    %22 = vector.shape_cast %21 : vector<1x32xf32> to vector<1x32xf32>
    %23 = vector.broadcast %22 : vector<1x32xf32> to vector<8x32xf32>
    %cst_26 = arith.constant 0.000000e+00 : f32
    %24 = vector.broadcast %cst_26 : f32 to vector<8x32xf32>
    %c0_i32 = arith.constant 0 : i32
    %c8_i32 = arith.constant 8 : i32
    %25 = arith.muli %c0_i32, %c8_i32 : i32
    %26 = tpu.assume_multiple %25, 8 : i32
    %27 = arith.index_cast %26 : i32 to index
    %c0_27 = arith.constant 0 : index
    %28 = vector.load %arg16[%27, %c0_27] : memref<64x32xf32, #tpu.memory_space<vmem>>, vector<8x32xf32>
    %29 = arith.index_cast %26 : i32 to index
    %c0_28 = arith.constant 0 : index
    %30 = vector.load %arg17[%29, %c0_28] : memref<64x32xf32, #tpu.memory_space<vmem>>, vector<8x32xf32>
    %31 = arith.index_cast %26 : i32 to index
    %c0_29 = arith.constant 0 : index
    %32 = vector.load %arg18[%31, %c0_29] : memref<64x32xf32, #tpu.memory_space<vmem>>, vector<8x32xf32>
    %33 = arith.truncf %24 : vector<8x32xf32> to vector<8x32xbf16>
    %c0_30 = arith.constant 0 : index
    %c0_31 = arith.constant 0 : index
    %34 = vector.load %arg6[%c0_30, %c0_31] : memref<32x32xbf16, #tpu.memory_space<vmem>>, vector<32x32xbf16>
    %cst_32 = arith.constant dense<0.000000e+00> : vector<8x32xf32>
    %35 = tpu.matmul %33, %34, %cst_32 {dimension_numbers = #tpu.dot_dimension_numbers<[1], [0], [0], [1], [0, 0, 1, 1], [], []>} : vector<8x32xbf16>, vector<32x32xbf16>, vector<8x32xf32> -> vector<8x32xf32>
    %c0_33 = arith.constant 0 : index
    %c0_34 = arith.constant 0 : index
    %36 = vector.load %arg7[%c0_33, %c0_34] : memref<32x32xbf16, #tpu.memory_space<vmem>>, vector<32x32xbf16>
    %cst_35 = arith.constant dense<0.000000e+00> : vector<8x32xf32>
    %37 = tpu.matmul %33, %36, %cst_35 {dimension_numbers = #tpu.dot_dimension_numbers<[1], [0], [0], [1], [0, 0, 1, 1], [], []>} : vector<8x32xbf16>, vector<32x32xbf16>, vector<8x32xf32> -> vector<8x32xf32>
    %c0_36 = arith.constant 0 : index
    %c0_37 = arith.constant 0 : index
    %38 = vector.load %arg8[%c0_36, %c0_37] : memref<32x32xbf16, #tpu.memory_space<vmem>>, vector<32x32xbf16>
    %cst_38 = arith.constant dense<0.000000e+00> : vector<8x32xf32>
    %39 = tpu.matmul %33, %38, %cst_38 {dimension_numbers = #tpu.dot_dimension_numbers<[1], [0], [0], [1], [0, 0, 1, 1], [], []>} : vector<8x32xbf16>, vector<32x32xbf16>, vector<8x32xf32> -> vector<8x32xf32>
    %40 = arith.addf %39, %23 : vector<8x32xf32>
    %41 = arith.addf %28, %35 : vector<8x32xf32>
    %42 = arith.negf %41 : vector<8x32xf32>
    %43 = math.exp %42 : vector<8x32xf32>
    %cst_39 = arith.constant 1.000000e+00 : f32
    %44 = vector.broadcast %cst_39 : f32 to vector<8x32xf32>
    %45 = arith.addf %44, %43 : vector<8x32xf32>
    %46 = arith.divf %44, %45 : vector<8x32xf32>
    %47 = arith.addf %30, %37 : vector<8x32xf32>
    %48 = arith.negf %47 : vector<8x32xf32>
    %49 = math.exp %48 : vector<8x32xf32>
    %cst_40 = arith.constant 1.000000e+00 : f32
    %50 = vector.broadcast %cst_40 : f32 to vector<8x32xf32>
    %51 = arith.addf %50, %49 : vector<8x32xf32>
    %52 = arith.divf %50, %51 : vector<8x32xf32>
    %53 = arith.mulf %46, %40 : vector<8x32xf32>
    %54 = arith.addf %32, %53 : vector<8x32xf32>
    %55 = math.tanh %54 : vector<8x32xf32>
    %56 = arith.subf %24, %55 : vector<8x32xf32>
    %57 = arith.mulf %52, %56 : vector<8x32xf32>
    %58 = arith.addf %55, %57 : vector<8x32xf32>
    %59 = vector.broadcast %c0_i32 : i32 to vector<8x1xi32>
    %60 = arith.cmpi slt, %59, %20 : vector<8x1xi32>
    %61 = vector.shape_cast %60 : vector<8x1xi1> to vector<8x1xi1>
    %62 = vector.broadcast %61 : vector<8x1xi1> to vector<8x32xi1>
    %63 = arith.select %62, %58, %24 : vector<8x32xi1>, vector<8x32xf32>
    %c1_i32 = arith.constant 1 : i32
    %c8_i32_41 = arith.constant 8 : i32
    %64 = arith.muli %c1_i32, %c8_i32_41 : i32
    %65 = tpu.assume_multiple %64, 8 : i32
    %66 = arith.index_cast %65 : i32 to index
    %c0_42 = arith.constant 0 : index
    %67 = vector.load %arg16[%66, %c0_42] : memref<64x32xf32, #tpu.memory_space<vmem>>, vector<8x32xf32>
    %68 = arith.index_cast %65 : i32 to index
    %c0_43 = arith.constant 0 : index
    %69 = vector.load %arg17[%68, %c0_43] : memref<64x32xf32, #tpu.memory_space<vmem>>, vector<8x32xf32>
    %70 = arith.index_cast %65 : i32 to index
    %c0_44 = arith.constant 0 : index
    %71 = vector.load %arg18[%70, %c0_44] : memref<64x32xf32, #tpu.memory_space<vmem>>, vector<8x32xf32>
    %72 = arith.truncf %63 : vector<8x32xf32> to vector<8x32xbf16>
    %c0_45 = arith.constant 0 : index
    %c0_46 = arith.constant 0 : index
    %73 = vector.load %arg6[%c0_45, %c0_46] : memref<32x32xbf16, #tpu.memory_space<vmem>>, vector<32x32xbf16>
    %cst_47 = arith.constant dense<0.000000e+00> : vector<8x32xf32>
    %74 = tpu.matmul %72, %73, %cst_47 {dimension_numbers = #tpu.dot_dimension_numbers<[1], [0], [0], [1], [0, 0, 1, 1], [], []>} : vector<8x32xbf16>, vector<32x32xbf16>, vector<8x32xf32> -> vector<8x32xf32>
    %c0_48 = arith.constant 0 : index
    %c0_49 = arith.constant 0 : index
    %75 = vector.load %arg7[%c0_48, %c0_49] : memref<32x32xbf16, #tpu.memory_space<vmem>>, vector<32x32xbf16>
    %cst_50 = arith.constant dense<0.000000e+00> : vector<8x32xf32>
    %76 = tpu.matmul %72, %75, %cst_50 {dimension_numbers = #tpu.dot_dimension_numbers<[1], [0], [0], [1], [0, 0, 1, 1], [], []>} : vector<8x32xbf16>, vector<32x32xbf16>, vector<8x32xf32> -> vector<8x32xf32>
    %c0_51 = arith.constant 0 : index
    %c0_52 = arith.constant 0 : index
    %77 = vector.load %arg8[%c0_51, %c0_52] : memref<32x32xbf16, #tpu.memory_space<vmem>>, vector<32x32xbf16>
    %cst_53 = arith.constant dense<0.000000e+00> : vector<8x32xf32>
    %78 = tpu.matmul %72, %77, %cst_53 {dimension_numbers = #tpu.dot_dimension_numbers<[1], [0], [0], [1], [0, 0, 1, 1], [], []>} : vector<8x32xbf16>, vector<32x32xbf16>, vector<8x32xf32> -> vector<8x32xf32>
    %79 = arith.addf %78, %23 : vector<8x32xf32>
    %80 = arith.addf %67, %74 : vector<8x32xf32>
    %81 = arith.negf %80 : vector<8x32xf32>
    %82 = math.exp %81 : vector<8x32xf32>
    %cst_54 = arith.constant 1.000000e+00 : f32
    %83 = vector.broadcast %cst_54 : f32 to vector<8x32xf32>
    %84 = arith.addf %83, %82 : vector<8x32xf32>
    %85 = arith.divf %83, %84 : vector<8x32xf32>
    %86 = arith.addf %69, %76 : vector<8x32xf32>
    %87 = arith.negf %86 : vector<8x32xf32>
    %88 = math.exp %87 : vector<8x32xf32>
    %cst_55 = arith.constant 1.000000e+00 : f32
    %89 = vector.broadcast %cst_55 : f32 to vector<8x32xf32>
    %90 = arith.addf %89, %88 : vector<8x32xf32>
    %91 = arith.divf %89, %90 : vector<8x32xf32>
    %92 = arith.mulf %85, %79 : vector<8x32xf32>
    %93 = arith.addf %71, %92 : vector<8x32xf32>
    %94 = math.tanh %93 : vector<8x32xf32>
    %95 = arith.subf %63, %94 : vector<8x32xf32>
    %96 = arith.mulf %91, %95 : vector<8x32xf32>
    %97 = arith.addf %94, %96 : vector<8x32xf32>
    %98 = vector.broadcast %c1_i32 : i32 to vector<8x1xi32>
    %99 = arith.cmpi slt, %98, %20 : vector<8x1xi32>
    %100 = vector.shape_cast %99 : vector<8x1xi1> to vector<8x1xi1>
    %101 = vector.broadcast %100 : vector<8x1xi1> to vector<8x32xi1>
    %102 = arith.select %101, %97, %63 : vector<8x32xi1>, vector<8x32xf32>
    %c2_i32 = arith.constant 2 : i32
    %c8_i32_56 = arith.constant 8 : i32
    %103 = arith.muli %c2_i32, %c8_i32_56 : i32
    %104 = tpu.assume_multiple %103, 8 : i32
    %105 = arith.index_cast %104 : i32 to index
    %c0_57 = arith.constant 0 : index
    %106 = vector.load %arg16[%105, %c0_57] : memref<64x32xf32, #tpu.memory_space<vmem>>, vector<8x32xf32>
    %107 = arith.index_cast %104 : i32 to index
    %c0_58 = arith.constant 0 : index
    %108 = vector.load %arg17[%107, %c0_58] : memref<64x32xf32, #tpu.memory_space<vmem>>, vector<8x32xf32>
    %109 = arith.index_cast %104 : i32 to index
    %c0_59 = arith.constant 0 : index
    %110 = vector.load %arg18[%109, %c0_59] : memref<64x32xf32, #tpu.memory_space<vmem>>, vector<8x32xf32>
    %111 = arith.truncf %102 : vector<8x32xf32> to vector<8x32xbf16>
    %c0_60 = arith.constant 0 : index
    %c0_61 = arith.constant 0 : index
    %112 = vector.load %arg6[%c0_60, %c0_61] : memref<32x32xbf16, #tpu.memory_space<vmem>>, vector<32x32xbf16>
    %cst_62 = arith.constant dense<0.000000e+00> : vector<8x32xf32>
    %113 = tpu.matmul %111, %112, %cst_62 {dimension_numbers = #tpu.dot_dimension_numbers<[1], [0], [0], [1], [0, 0, 1, 1], [], []>} : vector<8x32xbf16>, vector<32x32xbf16>, vector<8x32xf32> -> vector<8x32xf32>
    %c0_63 = arith.constant 0 : index
    %c0_64 = arith.constant 0 : index
    %114 = vector.load %arg7[%c0_63, %c0_64] : memref<32x32xbf16, #tpu.memory_space<vmem>>, vector<32x32xbf16>
    %cst_65 = arith.constant dense<0.000000e+00> : vector<8x32xf32>
    %115 = tpu.matmul %111, %114, %cst_65 {dimension_numbers = #tpu.dot_dimension_numbers<[1], [0], [0], [1], [0, 0, 1, 1], [], []>} : vector<8x32xbf16>, vector<32x32xbf16>, vector<8x32xf32> -> vector<8x32xf32>
    %c0_66 = arith.constant 0 : index
    %c0_67 = arith.constant 0 : index
    %116 = vector.load %arg8[%c0_66, %c0_67] : memref<32x32xbf16, #tpu.memory_space<vmem>>, vector<32x32xbf16>
    %cst_68 = arith.constant dense<0.000000e+00> : vector<8x32xf32>
    %117 = tpu.matmul %111, %116, %cst_68 {dimension_numbers = #tpu.dot_dimension_numbers<[1], [0], [0], [1], [0, 0, 1, 1], [], []>} : vector<8x32xbf16>, vector<32x32xbf16>, vector<8x32xf32> -> vector<8x32xf32>
    %118 = arith.addf %117, %23 : vector<8x32xf32>
    %119 = arith.addf %106, %113 : vector<8x32xf32>
    %120 = arith.negf %119 : vector<8x32xf32>
    %121 = math.exp %120 : vector<8x32xf32>
    %cst_69 = arith.constant 1.000000e+00 : f32
    %122 = vector.broadcast %cst_69 : f32 to vector<8x32xf32>
    %123 = arith.addf %122, %121 : vector<8x32xf32>
    %124 = arith.divf %122, %123 : vector<8x32xf32>
    %125 = arith.addf %108, %115 : vector<8x32xf32>
    %126 = arith.negf %125 : vector<8x32xf32>
    %127 = math.exp %126 : vector<8x32xf32>
    %cst_70 = arith.constant 1.000000e+00 : f32
    %128 = vector.broadcast %cst_70 : f32 to vector<8x32xf32>
    %129 = arith.addf %128, %127 : vector<8x32xf32>
    %130 = arith.divf %128, %129 : vector<8x32xf32>
    %131 = arith.mulf %124, %118 : vector<8x32xf32>
    %132 = arith.addf %110, %131 : vector<8x32xf32>
    %133 = math.tanh %132 : vector<8x32xf32>
    %134 = arith.subf %102, %133 : vector<8x32xf32>
    %135 = arith.mulf %130, %134 : vector<8x32xf32>
    %136 = arith.addf %133, %135 : vector<8x32xf32>
    %137 = vector.broadcast %c2_i32 : i32 to vector<8x1xi32>
    %138 = arith.cmpi slt, %137, %20 : vector<8x1xi32>
    %139 = vector.shape_cast %138 : vector<8x1xi1> to vector<8x1xi1>
    %140 = vector.broadcast %139 : vector<8x1xi1> to vector<8x32xi1>
    %141 = arith.select %140, %136, %102 : vector<8x32xi1>, vector<8x32xf32>
    %c3_i32 = arith.constant 3 : i32
    %c8_i32_71 = arith.constant 8 : i32
    %142 = arith.muli %c3_i32, %c8_i32_71 : i32
    %143 = tpu.assume_multiple %142, 8 : i32
    %144 = arith.index_cast %143 : i32 to index
    %c0_72 = arith.constant 0 : index
    %145 = vector.load %arg16[%144, %c0_72] : memref<64x32xf32, #tpu.memory_space<vmem>>, vector<8x32xf32>
    %146 = arith.index_cast %143 : i32 to index
    %c0_73 = arith.constant 0 : index
    %147 = vector.load %arg17[%146, %c0_73] : memref<64x32xf32, #tpu.memory_space<vmem>>, vector<8x32xf32>
    %148 = arith.index_cast %143 : i32 to index
    %c0_74 = arith.constant 0 : index
    %149 = vector.load %arg18[%148, %c0_74] : memref<64x32xf32, #tpu.memory_space<vmem>>, vector<8x32xf32>
    %150 = arith.truncf %141 : vector<8x32xf32> to vector<8x32xbf16>
    %c0_75 = arith.constant 0 : index
    %c0_76 = arith.constant 0 : index
    %151 = vector.load %arg6[%c0_75, %c0_76] : memref<32x32xbf16, #tpu.memory_space<vmem>>, vector<32x32xbf16>
    %cst_77 = arith.constant dense<0.000000e+00> : vector<8x32xf32>
    %152 = tpu.matmul %150, %151, %cst_77 {dimension_numbers = #tpu.dot_dimension_numbers<[1], [0], [0], [1], [0, 0, 1, 1], [], []>} : vector<8x32xbf16>, vector<32x32xbf16>, vector<8x32xf32> -> vector<8x32xf32>
    %c0_78 = arith.constant 0 : index
    %c0_79 = arith.constant 0 : index
    %153 = vector.load %arg7[%c0_78, %c0_79] : memref<32x32xbf16, #tpu.memory_space<vmem>>, vector<32x32xbf16>
    %cst_80 = arith.constant dense<0.000000e+00> : vector<8x32xf32>
    %154 = tpu.matmul %150, %153, %cst_80 {dimension_numbers = #tpu.dot_dimension_numbers<[1], [0], [0], [1], [0, 0, 1, 1], [], []>} : vector<8x32xbf16>, vector<32x32xbf16>, vector<8x32xf32> -> vector<8x32xf32>
    %c0_81 = arith.constant 0 : index
    %c0_82 = arith.constant 0 : index
    %155 = vector.load %arg8[%c0_81, %c0_82] : memref<32x32xbf16, #tpu.memory_space<vmem>>, vector<32x32xbf16>
    %cst_83 = arith.constant dense<0.000000e+00> : vector<8x32xf32>
    %156 = tpu.matmul %150, %155, %cst_83 {dimension_numbers = #tpu.dot_dimension_numbers<[1], [0], [0], [1], [0, 0, 1, 1], [], []>} : vector<8x32xbf16>, vector<32x32xbf16>, vector<8x32xf32> -> vector<8x32xf32>
    %157 = arith.addf %156, %23 : vector<8x32xf32>
    %158 = arith.addf %145, %152 : vector<8x32xf32>
    %159 = arith.negf %158 : vector<8x32xf32>
    %160 = math.exp %159 : vector<8x32xf32>
    %cst_84 = arith.constant 1.000000e+00 : f32
    %161 = vector.broadcast %cst_84 : f32 to vector<8x32xf32>
    %162 = arith.addf %161, %160 : vector<8x32xf32>
    %163 = arith.divf %161, %162 : vector<8x32xf32>
    %164 = arith.addf %147, %154 : vector<8x32xf32>
    %165 = arith.negf %164 : vector<8x32xf32>
    %166 = math.exp %165 : vector<8x32xf32>
    %cst_85 = arith.constant 1.000000e+00 : f32
    %167 = vector.broadcast %cst_85 : f32 to vector<8x32xf32>
    %168 = arith.addf %167, %166 : vector<8x32xf32>
    %169 = arith.divf %167, %168 : vector<8x32xf32>
    %170 = arith.mulf %163, %157 : vector<8x32xf32>
    %171 = arith.addf %149, %170 : vector<8x32xf32>
    %172 = math.tanh %171 : vector<8x32xf32>
    %173 = arith.subf %141, %172 : vector<8x32xf32>
    %174 = arith.mulf %169, %173 : vector<8x32xf32>
    %175 = arith.addf %172, %174 : vector<8x32xf32>
    %176 = vector.broadcast %c3_i32 : i32 to vector<8x1xi32>
    %177 = arith.cmpi slt, %176, %20 : vector<8x1xi32>
    %178 = vector.shape_cast %177 : vector<8x1xi1> to vector<8x1xi1>
    %179 = vector.broadcast %178 : vector<8x1xi1> to vector<8x32xi1>
    %180 = arith.select %179, %175, %141 : vector<8x32xi1>, vector<8x32xf32>
    %c4_i32 = arith.constant 4 : i32
    %c8_i32_86 = arith.constant 8 : i32
    %181 = arith.muli %c4_i32, %c8_i32_86 : i32
    %182 = tpu.assume_multiple %181, 8 : i32
    %183 = arith.index_cast %182 : i32 to index
    %c0_87 = arith.constant 0 : index
    %184 = vector.load %arg16[%183, %c0_87] : memref<64x32xf32, #tpu.memory_space<vmem>>, vector<8x32xf32>
    %185 = arith.index_cast %182 : i32 to index
    %c0_88 = arith.constant 0 : index
    %186 = vector.load %arg17[%185, %c0_88] : memref<64x32xf32, #tpu.memory_space<vmem>>, vector<8x32xf32>
    %187 = arith.index_cast %182 : i32 to index
    %c0_89 = arith.constant 0 : index
    %188 = vector.load %arg18[%187, %c0_89] : memref<64x32xf32, #tpu.memory_space<vmem>>, vector<8x32xf32>
    %189 = arith.truncf %180 : vector<8x32xf32> to vector<8x32xbf16>
    %c0_90 = arith.constant 0 : index
    %c0_91 = arith.constant 0 : index
    %190 = vector.load %arg6[%c0_90, %c0_91] : memref<32x32xbf16, #tpu.memory_space<vmem>>, vector<32x32xbf16>
    %cst_92 = arith.constant dense<0.000000e+00> : vector<8x32xf32>
    %191 = tpu.matmul %189, %190, %cst_92 {dimension_numbers = #tpu.dot_dimension_numbers<[1], [0], [0], [1], [0, 0, 1, 1], [], []>} : vector<8x32xbf16>, vector<32x32xbf16>, vector<8x32xf32> -> vector<8x32xf32>
    %c0_93 = arith.constant 0 : index
    %c0_94 = arith.constant 0 : index
    %192 = vector.load %arg7[%c0_93, %c0_94] : memref<32x32xbf16, #tpu.memory_space<vmem>>, vector<32x32xbf16>
    %cst_95 = arith.constant dense<0.000000e+00> : vector<8x32xf32>
    %193 = tpu.matmul %189, %192, %cst_95 {dimension_numbers = #tpu.dot_dimension_numbers<[1], [0], [0], [1], [0, 0, 1, 1], [], []>} : vector<8x32xbf16>, vector<32x32xbf16>, vector<8x32xf32> -> vector<8x32xf32>
    %c0_96 = arith.constant 0 : index
    %c0_97 = arith.constant 0 : index
    %194 = vector.load %arg8[%c0_96, %c0_97] : memref<32x32xbf16, #tpu.memory_space<vmem>>, vector<32x32xbf16>
    %cst_98 = arith.constant dense<0.000000e+00> : vector<8x32xf32>
    %195 = tpu.matmul %189, %194, %cst_98 {dimension_numbers = #tpu.dot_dimension_numbers<[1], [0], [0], [1], [0, 0, 1, 1], [], []>} : vector<8x32xbf16>, vector<32x32xbf16>, vector<8x32xf32> -> vector<8x32xf32>
    %196 = arith.addf %195, %23 : vector<8x32xf32>
    %197 = arith.addf %184, %191 : vector<8x32xf32>
    %198 = arith.negf %197 : vector<8x32xf32>
    %199 = math.exp %198 : vector<8x32xf32>
    %cst_99 = arith.constant 1.000000e+00 : f32
    %200 = vector.broadcast %cst_99 : f32 to vector<8x32xf32>
    %201 = arith.addf %200, %199 : vector<8x32xf32>
    %202 = arith.divf %200, %201 : vector<8x32xf32>
    %203 = arith.addf %186, %193 : vector<8x32xf32>
    %204 = arith.negf %203 : vector<8x32xf32>
    %205 = math.exp %204 : vector<8x32xf32>
    %cst_100 = arith.constant 1.000000e+00 : f32
    %206 = vector.broadcast %cst_100 : f32 to vector<8x32xf32>
    %207 = arith.addf %206, %205 : vector<8x32xf32>
    %208 = arith.divf %206, %207 : vector<8x32xf32>
    %209 = arith.mulf %202, %196 : vector<8x32xf32>
    %210 = arith.addf %188, %209 : vector<8x32xf32>
    %211 = math.tanh %210 : vector<8x32xf32>
    %212 = arith.subf %180, %211 : vector<8x32xf32>
    %213 = arith.mulf %208, %212 : vector<8x32xf32>
    %214 = arith.addf %211, %213 : vector<8x32xf32>
    %215 = vector.broadcast %c4_i32 : i32 to vector<8x1xi32>
    %216 = arith.cmpi slt, %215, %20 : vector<8x1xi32>
    %217 = vector.shape_cast %216 : vector<8x1xi1> to vector<8x1xi1>
    %218 = vector.broadcast %217 : vector<8x1xi1> to vector<8x32xi1>
    %219 = arith.select %218, %214, %180 : vector<8x32xi1>, vector<8x32xf32>
    %c5_i32 = arith.constant 5 : i32
    %c8_i32_101 = arith.constant 8 : i32
    %220 = arith.muli %c5_i32, %c8_i32_101 : i32
    %221 = tpu.assume_multiple %220, 8 : i32
    %222 = arith.index_cast %221 : i32 to index
    %c0_102 = arith.constant 0 : index
    %223 = vector.load %arg16[%222, %c0_102] : memref<64x32xf32, #tpu.memory_space<vmem>>, vector<8x32xf32>
    %224 = arith.index_cast %221 : i32 to index
    %c0_103 = arith.constant 0 : index
    %225 = vector.load %arg17[%224, %c0_103] : memref<64x32xf32, #tpu.memory_space<vmem>>, vector<8x32xf32>
    %226 = arith.index_cast %221 : i32 to index
    %c0_104 = arith.constant 0 : index
    %227 = vector.load %arg18[%226, %c0_104] : memref<64x32xf32, #tpu.memory_space<vmem>>, vector<8x32xf32>
    %228 = arith.truncf %219 : vector<8x32xf32> to vector<8x32xbf16>
    %c0_105 = arith.constant 0 : index
    %c0_106 = arith.constant 0 : index
    %229 = vector.load %arg6[%c0_105, %c0_106] : memref<32x32xbf16, #tpu.memory_space<vmem>>, vector<32x32xbf16>
    %cst_107 = arith.constant dense<0.000000e+00> : vector<8x32xf32>
    %230 = tpu.matmul %228, %229, %cst_107 {dimension_numbers = #tpu.dot_dimension_numbers<[1], [0], [0], [1], [0, 0, 1, 1], [], []>} : vector<8x32xbf16>, vector<32x32xbf16>, vector<8x32xf32> -> vector<8x32xf32>
    %c0_108 = arith.constant 0 : index
    %c0_109 = arith.constant 0 : index
    %231 = vector.load %arg7[%c0_108, %c0_109] : memref<32x32xbf16, #tpu.memory_space<vmem>>, vector<32x32xbf16>
    %cst_110 = arith.constant dense<0.000000e+00> : vector<8x32xf32>
    %232 = tpu.matmul %228, %231, %cst_110 {dimension_numbers = #tpu.dot_dimension_numbers<[1], [0], [0], [1], [0, 0, 1, 1], [], []>} : vector<8x32xbf16>, vector<32x32xbf16>, vector<8x32xf32> -> vector<8x32xf32>
    %c0_111 = arith.constant 0 : index
    %c0_112 = arith.constant 0 : index
    %233 = vector.load %arg8[%c0_111, %c0_112] : memref<32x32xbf16, #tpu.memory_space<vmem>>, vector<32x32xbf16>
    %cst_113 = arith.constant dense<0.000000e+00> : vector<8x32xf32>
    %234 = tpu.matmul %228, %233, %cst_113 {dimension_numbers = #tpu.dot_dimension_numbers<[1], [0], [0], [1], [0, 0, 1, 1], [], []>} : vector<8x32xbf16>, vector<32x32xbf16>, vector<8x32xf32> -> vector<8x32xf32>
    %235 = arith.addf %234, %23 : vector<8x32xf32>
    %236 = arith.addf %223, %230 : vector<8x32xf32>
    %237 = arith.negf %236 : vector<8x32xf32>
    %238 = math.exp %237 : vector<8x32xf32>
    %cst_114 = arith.constant 1.000000e+00 : f32
    %239 = vector.broadcast %cst_114 : f32 to vector<8x32xf32>
    %240 = arith.addf %239, %238 : vector<8x32xf32>
    %241 = arith.divf %239, %240 : vector<8x32xf32>
    %242 = arith.addf %225, %232 : vector<8x32xf32>
    %243 = arith.negf %242 : vector<8x32xf32>
    %244 = math.exp %243 : vector<8x32xf32>
    %cst_115 = arith.constant 1.000000e+00 : f32
    %245 = vector.broadcast %cst_115 : f32 to vector<8x32xf32>
    %246 = arith.addf %245, %244 : vector<8x32xf32>
    %247 = arith.divf %245, %246 : vector<8x32xf32>
    %248 = arith.mulf %241, %235 : vector<8x32xf32>
    %249 = arith.addf %227, %248 : vector<8x32xf32>
    %250 = math.tanh %249 : vector<8x32xf32>
    %251 = arith.subf %219, %250 : vector<8x32xf32>
    %252 = arith.mulf %247, %251 : vector<8x32xf32>
    %253 = arith.addf %250, %252 : vector<8x32xf32>
    %254 = vector.broadcast %c5_i32 : i32 to vector<8x1xi32>
    %255 = arith.cmpi slt, %254, %20 : vector<8x1xi32>
    %256 = vector.shape_cast %255 : vector<8x1xi1> to vector<8x1xi1>
    %257 = vector.broadcast %256 : vector<8x1xi1> to vector<8x32xi1>
    %258 = arith.select %257, %253, %219 : vector<8x32xi1>, vector<8x32xf32>
    %c6_i32 = arith.constant 6 : i32
    %c8_i32_116 = arith.constant 8 : i32
    %259 = arith.muli %c6_i32, %c8_i32_116 : i32
    %260 = tpu.assume_multiple %259, 8 : i32
    %261 = arith.index_cast %260 : i32 to index
    %c0_117 = arith.constant 0 : index
    %262 = vector.load %arg16[%261, %c0_117] : memref<64x32xf32, #tpu.memory_space<vmem>>, vector<8x32xf32>
    %263 = arith.index_cast %260 : i32 to index
    %c0_118 = arith.constant 0 : index
    %264 = vector.load %arg17[%263, %c0_118] : memref<64x32xf32, #tpu.memory_space<vmem>>, vector<8x32xf32>
    %265 = arith.index_cast %260 : i32 to index
    %c0_119 = arith.constant 0 : index
    %266 = vector.load %arg18[%265, %c0_119] : memref<64x32xf32, #tpu.memory_space<vmem>>, vector<8x32xf32>
    %267 = arith.truncf %258 : vector<8x32xf32> to vector<8x32xbf16>
    %c0_120 = arith.constant 0 : index
    %c0_121 = arith.constant 0 : index
    %268 = vector.load %arg6[%c0_120, %c0_121] : memref<32x32xbf16, #tpu.memory_space<vmem>>, vector<32x32xbf16>
    %cst_122 = arith.constant dense<0.000000e+00> : vector<8x32xf32>
    %269 = tpu.matmul %267, %268, %cst_122 {dimension_numbers = #tpu.dot_dimension_numbers<[1], [0], [0], [1], [0, 0, 1, 1], [], []>} : vector<8x32xbf16>, vector<32x32xbf16>, vector<8x32xf32> -> vector<8x32xf32>
    %c0_123 = arith.constant 0 : index
    %c0_124 = arith.constant 0 : index
    %270 = vector.load %arg7[%c0_123, %c0_124] : memref<32x32xbf16, #tpu.memory_space<vmem>>, vector<32x32xbf16>
    %cst_125 = arith.constant dense<0.000000e+00> : vector<8x32xf32>
    %271 = tpu.matmul %267, %270, %cst_125 {dimension_numbers = #tpu.dot_dimension_numbers<[1], [0], [0], [1], [0, 0, 1, 1], [], []>} : vector<8x32xbf16>, vector<32x32xbf16>, vector<8x32xf32> -> vector<8x32xf32>
    %c0_126 = arith.constant 0 : index
    %c0_127 = arith.constant 0 : index
    %272 = vector.load %arg8[%c0_126, %c0_127] : memref<32x32xbf16, #tpu.memory_space<vmem>>, vector<32x32xbf16>
    %cst_128 = arith.constant dense<0.000000e+00> : vector<8x32xf32>
    %273 = tpu.matmul %267, %272, %cst_128 {dimension_numbers = #tpu.dot_dimension_numbers<[1], [0], [0], [1], [0, 0, 1, 1], [], []>} : vector<8x32xbf16>, vector<32x32xbf16>, vector<8x32xf32> -> vector<8x32xf32>
    %274 = arith.addf %273, %23 : vector<8x32xf32>
    %275 = arith.addf %262, %269 : vector<8x32xf32>
    %276 = arith.negf %275 : vector<8x32xf32>
    %277 = math.exp %276 : vector<8x32xf32>
    %cst_129 = arith.constant 1.000000e+00 : f32
    %278 = vector.broadcast %cst_129 : f32 to vector<8x32xf32>
    %279 = arith.addf %278, %277 : vector<8x32xf32>
    %280 = arith.divf %278, %279 : vector<8x32xf32>
    %281 = arith.addf %264, %271 : vector<8x32xf32>
    %282 = arith.negf %281 : vector<8x32xf32>
    %283 = math.exp %282 : vector<8x32xf32>
    %cst_130 = arith.constant 1.000000e+00 : f32
    %284 = vector.broadcast %cst_130 : f32 to vector<8x32xf32>
    %285 = arith.addf %284, %283 : vector<8x32xf32>
    %286 = arith.divf %284, %285 : vector<8x32xf32>
    %287 = arith.mulf %280, %274 : vector<8x32xf32>
    %288 = arith.addf %266, %287 : vector<8x32xf32>
    %289 = math.tanh %288 : vector<8x32xf32>
    %290 = arith.subf %258, %289 : vector<8x32xf32>
    %291 = arith.mulf %286, %290 : vector<8x32xf32>
    %292 = arith.addf %289, %291 : vector<8x32xf32>
    %293 = vector.broadcast %c6_i32 : i32 to vector<8x1xi32>
    %294 = arith.cmpi slt, %293, %20 : vector<8x1xi32>
    %295 = vector.shape_cast %294 : vector<8x1xi1> to vector<8x1xi1>
    %296 = vector.broadcast %295 : vector<8x1xi1> to vector<8x32xi1>
    %297 = arith.select %296, %292, %258 : vector<8x32xi1>, vector<8x32xf32>
    %c7_i32 = arith.constant 7 : i32
    %c8_i32_131 = arith.constant 8 : i32
    %298 = arith.muli %c7_i32, %c8_i32_131 : i32
    %299 = tpu.assume_multiple %298, 8 : i32
    %300 = arith.index_cast %299 : i32 to index
    %c0_132 = arith.constant 0 : index
    %301 = vector.load %arg16[%300, %c0_132] : memref<64x32xf32, #tpu.memory_space<vmem>>, vector<8x32xf32>
    %302 = arith.index_cast %299 : i32 to index
    %c0_133 = arith.constant 0 : index
    %303 = vector.load %arg17[%302, %c0_133] : memref<64x32xf32, #tpu.memory_space<vmem>>, vector<8x32xf32>
    %304 = arith.index_cast %299 : i32 to index
    %c0_134 = arith.constant 0 : index
    %305 = vector.load %arg18[%304, %c0_134] : memref<64x32xf32, #tpu.memory_space<vmem>>, vector<8x32xf32>
    %306 = arith.truncf %297 : vector<8x32xf32> to vector<8x32xbf16>
    %c0_135 = arith.constant 0 : index
    %c0_136 = arith.constant 0 : index
    %307 = vector.load %arg6[%c0_135, %c0_136] : memref<32x32xbf16, #tpu.memory_space<vmem>>, vector<32x32xbf16>
    %cst_137 = arith.constant dense<0.000000e+00> : vector<8x32xf32>
    %308 = tpu.matmul %306, %307, %cst_137 {dimension_numbers = #tpu.dot_dimension_numbers<[1], [0], [0], [1], [0, 0, 1, 1], [], []>} : vector<8x32xbf16>, vector<32x32xbf16>, vector<8x32xf32> -> vector<8x32xf32>
    %c0_138 = arith.constant 0 : index
    %c0_139 = arith.constant 0 : index
    %309 = vector.load %arg7[%c0_138, %c0_139] : memref<32x32xbf16, #tpu.memory_space<vmem>>, vector<32x32xbf16>
    %cst_140 = arith.constant dense<0.000000e+00> : vector<8x32xf32>
    %310 = tpu.matmul %306, %309, %cst_140 {dimension_numbers = #tpu.dot_dimension_numbers<[1], [0], [0], [1], [0, 0, 1, 1], [], []>} : vector<8x32xbf16>, vector<32x32xbf16>, vector<8x32xf32> -> vector<8x32xf32>
    %c0_141 = arith.constant 0 : index
    %c0_142 = arith.constant 0 : index
    %311 = vector.load %arg8[%c0_141, %c0_142] : memref<32x32xbf16, #tpu.memory_space<vmem>>, vector<32x32xbf16>
    %cst_143 = arith.constant dense<0.000000e+00> : vector<8x32xf32>
    %312 = tpu.matmul %306, %311, %cst_143 {dimension_numbers = #tpu.dot_dimension_numbers<[1], [0], [0], [1], [0, 0, 1, 1], [], []>} : vector<8x32xbf16>, vector<32x32xbf16>, vector<8x32xf32> -> vector<8x32xf32>
    %313 = arith.addf %312, %23 : vector<8x32xf32>
    %314 = arith.addf %301, %308 : vector<8x32xf32>
    %315 = arith.negf %314 : vector<8x32xf32>
    %316 = math.exp %315 : vector<8x32xf32>
    %cst_144 = arith.constant 1.000000e+00 : f32
    %317 = vector.broadcast %cst_144 : f32 to vector<8x32xf32>
    %318 = arith.addf %317, %316 : vector<8x32xf32>
    %319 = arith.divf %317, %318 : vector<8x32xf32>
    %320 = arith.addf %303, %310 : vector<8x32xf32>
    %321 = arith.negf %320 : vector<8x32xf32>
    %322 = math.exp %321 : vector<8x32xf32>
    %cst_145 = arith.constant 1.000000e+00 : f32
    %323 = vector.broadcast %cst_145 : f32 to vector<8x32xf32>
    %324 = arith.addf %323, %322 : vector<8x32xf32>
    %325 = arith.divf %323, %324 : vector<8x32xf32>
    %326 = arith.mulf %319, %313 : vector<8x32xf32>
    %327 = arith.addf %305, %326 : vector<8x32xf32>
    %328 = math.tanh %327 : vector<8x32xf32>
    %329 = arith.subf %297, %328 : vector<8x32xf32>
    %330 = arith.mulf %325, %329 : vector<8x32xf32>
    %331 = arith.addf %328, %330 : vector<8x32xf32>
    %332 = vector.broadcast %c7_i32 : i32 to vector<8x1xi32>
    %333 = arith.cmpi slt, %332, %20 : vector<8x1xi32>
    %334 = vector.shape_cast %333 : vector<8x1xi1> to vector<8x1xi1>
    %335 = vector.broadcast %334 : vector<8x1xi1> to vector<8x32xi1>
    %336 = arith.select %335, %331, %297 : vector<8x32xi1>, vector<8x32xf32>
    %c8_i32_146 = arith.constant 8 : i32
    %337 = arith.truncf %336 : vector<8x32xf32> to vector<8x32xbf16>
    %c0_147 = arith.constant 0 : index
    %c0_148 = arith.constant 0 : index
    %338 = vector.load %arg13[%c0_147, %c0_148] : memref<32x1xbf16, #tpu.memory_space<vmem>>, vector<32x1xbf16>
    %cst_149 = arith.constant dense<0.000000e+00> : vector<8x1xf32>
    %339 = tpu.matmul %337, %338, %cst_149 {dimension_numbers = #tpu.dot_dimension_numbers<[1], [0], [0], [1], [0, 0, 1, 1], [], []>} : vector<8x32xbf16>, vector<32x1xbf16>, vector<8x1xf32> -> vector<8x1xf32>
    %c0_150 = arith.constant 0 : index
    %c0_151 = arith.constant 0 : index
    %340 = vector.load %arg14[%c0_150, %c0_151] : memref<1x1xf32, #tpu.memory_space<vmem>>, vector<1x1xf32>
    %341 = vector.broadcast %340 : vector<1x1xf32> to vector<8x1xf32>
    %342 = arith.addf %339, %341 : vector<8x1xf32>
    %c0_152 = arith.constant 0 : index
    %c0_153 = arith.constant 0 : index
    %343 = vector.load %arg15[%c0_152, %c0_153] : memref<8x1xf32, #tpu.memory_space<vmem>>, vector<8x1xf32>
    tpu.vector_store %arg15[%c0_152, %c0_153], %342 {strides = array<i32>} : memref<8x1xf32, #tpu.memory_space<vmem>>, vector<8x1xf32>,
    return
  }
  func.func @transform_0(%arg0: i32) -> (i32, i32, i32) {
    %c0_i32 = arith.constant 0 : i32
    %c0_i32_0 = arith.constant 0 : i32
    %c0_i32_1 = arith.constant 0 : i32
    return %c0_i32, %arg0, %c0_i32_0 : i32, i32, i32
  }
  func.func @transform_1(%arg0: i32) -> (i32, i32) {
    %c0_i32 = arith.constant 0 : i32
    %c0_i32_0 = arith.constant 0 : i32
    return %arg0, %c0_i32 : i32, i32
  }
  func.func @transform_2(%arg0: i32) -> (i32, i32) {
    %c0_i32 = arith.constant 0 : i32
    %c0_i32_0 = arith.constant 0 : i32
    %c0_i32_1 = arith.constant 0 : i32
    return %c0_i32, %c0_i32_0 : i32, i32
  }
  func.func @transform_3(%arg0: i32) -> (i32, i32) {
    %c0_i32 = arith.constant 0 : i32
    %c0_i32_0 = arith.constant 0 : i32
    %c0_i32_1 = arith.constant 0 : i32
    return %c0_i32, %c0_i32_0 : i32, i32
  }
  func.func @transform_4(%arg0: i32) -> (i32, i32) {
    %c0_i32 = arith.constant 0 : i32
    %c0_i32_0 = arith.constant 0 : i32
    %c0_i32_1 = arith.constant 0 : i32
    return %c0_i32, %c0_i32_0 : i32, i32
  }
  func.func @transform_5(%arg0: i32) -> (i32, i32) {
    %c0_i32 = arith.constant 0 : i32
    %c0_i32_0 = arith.constant 0 : i32
    %c0_i32_1 = arith.constant 0 : i32
    return %c0_i32, %c0_i32_0 : i32, i32
  }
  func.func @transform_6(%arg0: i32) -> (i32, i32) {
    %c0_i32 = arith.constant 0 : i32
    %c0_i32_0 = arith.constant 0 : i32
    %c0_i32_1 = arith.constant 0 : i32
    return %c0_i32, %c0_i32_0 : i32, i32
  }
  func.func @transform_7(%arg0: i32) -> (i32, i32) {
    %c0_i32 = arith.constant 0 : i32
    %c0_i32_0 = arith.constant 0 : i32
    %c0_i32_1 = arith.constant 0 : i32
    return %c0_i32, %c0_i32_0 : i32, i32
  }
  func.func @transform_8(%arg0: i32) -> (i32, i32) {
    %c0_i32 = arith.constant 0 : i32
    %c0_i32_0 = arith.constant 0 : i32
    %c0_i32_1 = arith.constant 0 : i32
    return %c0_i32, %c0_i32_0 : i32, i32
  }
  func.func @transform_9(%arg0: i32) -> (i32, i32) {
    %c0_i32 = arith.constant 0 : i32
    %c0_i32_0 = arith.constant 0 : i32
    %c0_i32_1 = arith.constant 0 : i32
    return %c0_i32, %c0_i32_0 : i32, i32
  }
  func.func @transform_10(%arg0: i32) -> (i32, i32) {
    %c0_i32 = arith.constant 0 : i32
    %c0_i32_0 = arith.constant 0 : i32
    %c0_i32_1 = arith.constant 0 : i32
    return %c0_i32, %c0_i32_0 : i32, i32
  }
  func.func @transform_11(%arg0: i32) -> (i32, i32) {
    %c0_i32 = arith.constant 0 : i32
    %c0_i32_0 = arith.constant 0 : i32
    %c0_i32_1 = arith.constant 0 : i32
    return %c0_i32, %c0_i32_0 : i32, i32
  }
  func.func @transform_12(%arg0: i32) -> (i32, i32) {
    %c0_i32 = arith.constant 0 : i32
    %c0_i32_0 = arith.constant 0 : i32
    %c0_i32_1 = arith.constant 0 : i32
    return %c0_i32, %c0_i32_0 : i32, i32
  }
  func.func @transform_13(%arg0: i32) -> (i32, i32) {
    %c0_i32 = arith.constant 0 : i32
    %c0_i32_0 = arith.constant 0 : i32
    %c0_i32_1 = arith.constant 0 : i32
    return %c0_i32, %c0_i32_0 : i32, i32
  }
  func.func @transform_14(%arg0: i32) -> (i32, i32) {
    %c0_i32 = arith.constant 0 : i32
    %c0_i32_0 = arith.constant 0 : i32
    return %arg0, %c0_i32 : i32, i32
  }
}

</mosaic_0001>

<bundles_post_ra>
// kernel: tpu_custom_call.1
= control target key start
LH: loop header
LB: loop body
LE: loop exit
PB: predicated region body
PF: predicated region fallthrough
CT: control target
= control target key end

     0   :  { %s2854_s0 = inlined_call_operand.hbm [shape: bf16[8,8,16], index: 0, kind: input, shape index: {}]   ;;  %s2855_s1 = inlined_call_operand.vmem [shape: s32[8,1], index: 1, kind: input, shape index: {}]   ;;  %s2856_s2 = inlined_call_operand.hbm [shape: bf16[16,32], index: 2, kind: input, shape index: {}]   ;;  %s2857_s3 = inlined_call_operand.hbm [shape: bf16[16,32], index: 3, kind: input, shape index: {}]   ;;  %s2858_s4 = inlined_call_operand.hbm [shape: bf16[16,32], index: 4, kind: input, shape index: {}]   ;;  %s2859_s5 = inlined_call_operand.vmem [shape: bf16[32,32], index: 5, kind: input, shape index: {}]   ;;  %s2860_s6 = inlined_call_operand.vmem [shape: bf16[32,32], index: 6, kind: input, shape index: {}]   ;;  %s2861_s7 = inlined_call_operand.vmem [shape: bf16[32,32], index: 7, kind: input, shape index: {}]   ;;  %s2862_s8 = inlined_call_operand.vmem [shape: f32[1,32], index: 8, kind: input, shape index: {}]   ;;  %s2863_s9 = inlined_call_operand.vmem [shape: f32[1,32], index: 9, kind: input, shape index: {}]   ;;  %s2864_s10 = inlined_call_operand.vmem [shape: f32[1,32], index: 10, kind: input, shape index: {}]   ;;  %s2865_s11 = inlined_call_operand.vmem [shape: f32[1,32], index: 11, kind: input, shape index: {}]   ;;  %s2866_s12 = inlined_call_operand.vmem [shape: bf16[32,1], index: 12, kind: input, shape index: {}]   ;;  %s2867_s13 = inlined_call_operand.<no memory space> [shape: f32[1,1], index: 13, kind: input, shape index: {}]   ;;  %s2868_s14 = inlined_call_operand.vmem [shape: f32[8,1], index: 14, kind: output, shape index: {}]  }
   0x1   :  { %v19_v0 = vstv %s2867_s13 }
   0x2   :  { %20 = vst [vmem:[#allocation5] sm:$0x1] %v19_v0 }
   0x3   :  { %21 = vsyncpa [#allocation7], 0 }
   0x4   :  { %22 = vsyncpa [#allocation9], 0 }
   0x5   :  { %23 = vsyncpa [#allocation12], 0  ;;  %s2388_s15 = smov [#allocation8]   ;;  %s2389_s17 = smov [#allocation6]  }
   0x6   :  { %s43_s16 = sshll.u32 %s2388_s15, 4  ;;  %s29_s18 = sshll.u32 %s2389_s17, 4  ;;  %s44_s16 = int_to_ptr.vmem [resolvable:$true] %s43_s16  ;;  %s2475_s18 = int_to_ptr.vmem [resolvable:$true] %s29_s18 }
   0x7   :  { %s2294_s21 = scalar_lea.hbm %s2856_s2, 128 }
   0x8   :  { %p2295_p0 = scmp.ne.s32.totalorder %s2856_s2, %s2294_s21  ;;  %p2298_p1 = scmp.lt.u32.totalorder %s2294_s21, %s2856_s2 }
   0xa   :  { %p2300_p2 = pnand %p2298_p1, %p2295_p0 }
   0xc   :  { %2303 = shalt.err (!%p2300_p2)
}
   0xd   :  { %s2304_s25 = scalar_lea.vmem %s44_s16, 128  ;;  %p2309_p4 = scmp.lt.s32.totalorder %s44_s16, %s44_s16 }
   0xe   :  { %p2305_p3 = scmp.ne.s32.totalorder %s44_s16, %s2304_s25  ;;  %p2310_p5 = scmp.lt.s32.totalorder %s2304_s25, %s2304_s25 }
  0x10   :  { %p2311_p6 = por %p2310_p5, %p2309_p4 }
  0x12   :  { %p2312_p7 = pnand %p2311_p6, %p2305_p3 }
  0x14   :  { %2315 = shalt.err (!%p2312_p7)
}
  0x15   :  { %s2390_s26 = smov 64   ;;  %s2391_s27 = smov 4  }
  0x16   :  { %49 = dma.hbm_to_vmem [thread:$0]  %s2856_s2, 128, %s44_s16, [#allocation9], %s2390_s26, %s2390_s26, %s2391_s27  }
  0x17   :  { %s2316_s17 = scalar_lea.hbm %s2854_s0, 512 }
  0x18   :  { %p2317_p8 = scmp.ne.s32.totalorder %s2854_s0, %s2316_s17  ;;  %p2320_p9 = scmp.lt.u32.totalorder %s2316_s17, %s2854_s0 }
  0x1a   :  { %p2322_p10 = pnand %p2320_p9, %p2317_p8 }
  0x1c   :  { %2325 = shalt.err (!%p2322_p10)
}
  0x1d   :  { %s2326_s23 = scalar_lea.vmem %s2475_s18, 512  ;;  %p2331_p12 = scmp.lt.s32.totalorder %s2475_s18, %s2475_s18 }
  0x1e   :  { %p2327_p11 = scmp.ne.s32.totalorder %s2475_s18, %s2326_s23  ;;  %p2332_p13 = scmp.lt.s32.totalorder %s2326_s23, %s2326_s23 }
  0x20   :  { %p2333_p0 = por %p2332_p13, %p2331_p12 }
  0x22   :  { %p2334_p1 = pnand %p2333_p0, %p2327_p11 }
  0x24   :  { %2337 = shalt.err (!%p2334_p1)
}
  0x25   :  { %35 = dma.hbm_to_vmem [thread:$0]  %s2854_s0, 512, %s2475_s18, [#allocation7], %s2390_s26, %s2390_s26, %s2391_s27  }
  0x26   :  { %s2392_s13 = smov [#allocation10]   ;;  %s2393_s25 = smov [#allocation11]  }
  0x27   :  { %s55_s24 = sshll.u32 %s2392_s13, 4  ;;  %s67_s28 = sshll.u32 %s2393_s25, 4  ;;  %s56_s24 = int_to_ptr.vmem [resolvable:$true] %s55_s24  ;;  %s2512_s28 = int_to_ptr.vmem [resolvable:$true] %s67_s28 }
  0x28   :  { %s2338_s15 = scalar_lea.hbm %s2857_s3, 128 }
  0x29   :  { %p2339_p2 = scmp.ne.s32.totalorder %s2857_s3, %s2338_s15  ;;  %p2342_p3 = scmp.lt.u32.totalorder %s2338_s15, %s2857_s3 }
  0x2b   :  { %p2344_p4 = pnand %p2342_p3, %p2339_p2 }
  0x2d   :  { %2347 = shalt.err (!%p2344_p4)
}
  0x2e   :  { %s2348_s0 = scalar_lea.vmem %s56_s24, 128  ;;  %p2353_p6 = scmp.lt.s32.totalorder %s56_s24, %s56_s24 }
  0x2f   :  { %p2349_p5 = scmp.ne.s32.totalorder %s56_s24, %s2348_s0  ;;  %p2354_p7 = scmp.lt.s32.totalorder %s2348_s0, %s2348_s0 }
  0x31   :  { %p2355_p8 = por %p2354_p7, %p2353_p6 }
  0x33   :  { %p2356_p9 = pnand %p2355_p8, %p2349_p5 }
  0x35   :  { %2359 = shalt.err (!%p2356_p9)
}
  0x36   :  { %61 = dma.hbm_to_vmem [thread:$0]  %s2857_s3, 128, %s56_s24, [#allocation9], %s2390_s26, %s2390_s26, %s2391_s27  }
  0x37   :  { %s2360_s16 = scalar_lea.hbm %s2858_s4, 128 }
  0x38   :  { %p2361_p10 = scmp.ne.s32.totalorder %s2858_s4, %s2360_s16  ;;  %p2364_p11 = scmp.lt.u32.totalorder %s2360_s16, %s2858_s4 }
  0x3a   :  { %p2366_p12 = pnand %p2364_p11, %p2361_p10 }
  0x3c   :  { %2369 = shalt.err (!%p2366_p12)
}
  0x3d   :  { %s2370_s15 = scalar_lea.vmem %s2512_s28, 128  ;;  %p2375_p0 = scmp.lt.s32.totalorder %s2512_s28, %s2512_s28 }
  0x3e   :  { %p2371_p13 = scmp.ne.s32.totalorder %s2512_s28, %s2370_s15  ;;  %p2376_p1 = scmp.lt.s32.totalorder %s2370_s15, %s2370_s15 }
  0x40   :  { %p2377_p2 = por %p2376_p1, %p2375_p0 }
  0x42   :  { %p2378_p3 = pnand %p2377_p2, %p2371_p13 }
  0x44   :  { %2381 = shalt.err (!%p2378_p3)
}
  0x45   :  { %73 = dma.hbm_to_vmem [thread:$0]  %s2858_s4, 128, %s2512_s28, [#allocation12], %s2390_s26, %s2390_s26, %s2391_s27  }
  0x46   :  { %2382 = dma.done.wait [#allocation7], 512  }
  0x47   :  { %2383 = vsyncadd [#allocation7], 4294966784 }
  0x48   :  { %2384 = dma.done.wait [#allocation9], 256  }
  0x49   :  { %2385 = vsyncadd [#allocation9], 4294967040 }
  0x4a   :  { %2386 = dma.done.wait [#allocation12], 128  }
  0x4b   :  { %2387 = vsyncadd [#allocation12], 4294967168  ;;  %v2394_v1 = vmov 0   ;;  %v2196_v2 = vld [vmem:[#allocation10] sm:$0xff]   ;;  %v2197_v3 = vld [vmem:[#allocation8] sm:$0xff]   ;;  %vm148_vm0 = vcmask 130048  }
  0x4c   :  { %2194 = vset.pattern.permute.xlu0 %v2394_v1  ;;  %2195 = vset.pattern.permute.xlu1 %v2394_v1  ;;  %v2198_v4 = vld [vmem:[#allocation6] sm:$0xff]   ;;  %v2199_v5 = vld [vmem:[#allocation6 + $0x8] sm:$0xff]   ;;  %v2395_v7 = vmov 0.0   ;;  %v2201_v8 = vld [vmem:[#allocation6 + $0x10] sm:$0xff]   ;;  %vm2396_vm3 = vmmov 0   ;;  %vm226_vm6 = vcmask 261120  }
  0x4d   :  { %1965 = vmatprep.subr.bf16.mxu1 %v2196_v2  ;;  %1955 = vmatprep.subr.bf16.mxu0 %v2197_v3  ;;  %v2555_v6 = vld [vmem:[%s2859_s5] sm:$0xff]   ;;  %v2565_v9 = vld [vmem:[%s2859_s5 + $0x8] sm:$0xff]   ;;  %v2204_v10 = vld [vmem:[#allocation11] sm:$0xff]  }
  0x4e   :  { %1966 = vmatpush3.bf16.msra.mxu1 %v2196_v2  ;;  %1967 = vmatprep.mubr.msk.bf16.mxu1 %vm148_vm0, %v2198_v4  ;;  %v2202_v11 = vld [vmem:[#allocation6 + $0x18] sm:$0xff]   ;;  %v2603_v17 = vld [vmem:[%s2860_s6 + $0x8] sm:$0xff]  }
  0x4f   :  { %1956 = vmatpush3.bf16.msra.mxu0 %v2197_v3  ;;  %1985 = vmatprep.subr.bf16.mxu1 %v2395_v7  ;;  %v2576_v12 = vld [vmem:[%s2855_s1] sm:$0xff]  ;;  %v2616_v19 = vld [vmem:[%s2861_s7 + $0x8] sm:$0xff]  }
  0x50   :  { %1957 = vmatprep.mubr.msk.bf16.mxu0 %vm148_vm0, %v2198_v4  ;;  %1975 = vmatprep.subr.bf16.mxu0 %v2204_v10  ;;  %vm613_vm1 = vcmp.gt.s32.totalorder %v2576_v12, 0  ;;  %vm770_vm2 = vcmp.gt.s32.totalorder %v2576_v12, 1  ;;  %v2590_v15 = vld [vmem:[%s2860_s6] sm:$0xff]   ;;  %vm1241_vm4 = vcmp.gt.s32.totalorder %v2576_v12, 4  ;;  %vm1555_vm5 = vcmp.gt.s32.totalorder %v2576_v12, 6 }
  0x51   :  { %1968 = vmatmul.mubr.msk.bf16.vlgmr.msra.gmra.mrb[0].mxu1 %vm148_vm0, %v2199_v5  ;;  %v614_v13 = vsel %vm613_vm1, 1, %v2394_v1  ;;  %v771_v14 = vsel %vm770_vm2, 1, %v2394_v1  ;;  %v2596_v16 = vld [vmem:[%s2861_s7] sm:$0xff]   ;;  %v1242_v18 = vsel %vm1241_vm4, 1, %v2394_v1  ;;  %v1556_v20 = vsel %vm1555_vm5, 1, %v2394_v1 }
  0x52   :  { %1986 = vmatpush3.bf16.msra.mxu1 %v2555_v6  ;;  %1958 = vmatmul.mubr.msk.bf16.vlgmr.msra.gmra.mrb[0].mxu0 %vm148_vm0, %v2199_v5  ;;  %v1805_v21 = vld [vmem:[%s2863_s9] ss:$0 sm:$0xff]  ;;  %vm927_vm8 = vcmp.gt.s32.totalorder %v2576_v12, 2  ;;  %vm1084_vm9 = vcmp.gt.s32.totalorder %v2576_v12, 3  ;;  %vm1398_vm10 = vcmp.gt.s32.totalorder %v2576_v12, 5  ;;  %vm1712_vm11 = vcmp.gt.s32.totalorder %v2576_v12, 7 }
  0x53   :  { %1971 = vmatprep.mubr.msk.bf16.mxu1 %vm148_vm0, %v2201_v8  ;;  %1987 = vmatprep.subr.bf16.mxu1 %v2395_v7  ;;  %v1795_v22 = vld [vmem:[%s2862_s8] ss:$0 sm:$0xff] }
  0x54   :  { %1961 = vmatprep.mubr.msk.bf16.mxu0 %vm148_vm0, %v2201_v8  ;;  %1976 = vmatpush3.bf16.msra.mxu0 %v2204_v10  ;;  %v1811_v57 = vld [vmem:[%s2864_s10] ss:$0 sm:$0xff] }
  0x55   :  { %2001 = vmatprep.subr.bf16.mxu0 %v2395_v7  ;;  %616 = vperm.xlu0 %2194, %v614_v13  }
  0x56   :  { %1988 = vmatpush3.bf16.msra.mxu1 %v2565_v9 }
  0x57   :  { %1993 = vmatprep.subr.bf16.mxu1 %v2395_v7 }
  0x59   :  { %1972 = vmatmul.mubr.msk.bf16.gmra.mrb[4].mxu1 %vm148_vm0, %v2202_v11  ;;  %773 = vperm.xlu0 %2194, %v771_v14  }
  0x5a   :  { %1989 = vmatprep.mubr.msk.bf16.mxu1 %vm2396_vm3, %v2395_v7  ;;  %1962 = vmatmul.mubr.msk.bf16.gmra.mrb[4].mxu0 %vm148_vm0, %v2202_v11 }
  0x5b   :  { %1977 = vmatprep.mubr.msk.bf16.mxu0 %vm148_vm0, %v2198_v4 }
  0x5d   :  { %1244 = vperm.xlu0 %2194, %v1242_v18  }
  0x61   :  { %1990 = vmatmul.mubr.bf16.vlgmr.msra.gmra.mrb[8].mxu1 %v2394_v1  ;;  %1558 = vperm.xlu0 %2194, %v1556_v20  }
  0x62   :  { %1994 = vmatpush3.bf16.msra.mxu1 %v2590_v15  ;;  %1997 = vmatprep.mubr.msk.bf16.mxu1 %vm2396_vm3, %v2395_v7 }
  0x63   :  { %1995 = vmatprep.subr.bf16.mxu1 %v2395_v7  ;;  %1978 = vmatmul.mubr.msk.bf16.vlgmr.msra.gmra.mrb[8].mxu0 %vm148_vm0, %v2199_v5 }
  0x64   :  { %2002 = vmatpush3.bf16.msra.mxu0 %v2596_v16  ;;  %1981 = vmatprep.mubr.msk.bf16.mxu0 %vm148_vm0, %v2201_v8 }
  0x65   :  { %2003 = vmatprep.subr.bf16.mxu0 %v2395_v7 }
  0x66   :  { %1996 = vmatpush3.bf16.msra.mxu1 %v2603_v17 }
  0x67   :  { %2009 = vmatprep.subr.bf16.mxu1 %v2395_v7 }
  0x68   :  { %2004 = vmatpush3.bf16.msra.mxu0 %v2616_v19 }
  0x69   :  { %1998 = vmatmul.mubr.bf16.vlgmr.msra.gmra.mrb[12].mxu1 %v2394_v1  ;;  %2017 = vmatprep.subr.bf16.mxu0 %v2395_v7 }
  0x6a   :  { %2010 = vmatpush3.bf16.msra.mxu1 %v2555_v6  ;;  %2013 = vmatprep.mubr.msk.bf16.mxu1 %vm2396_vm3, %v2395_v7 }
  0x6b   :  { %1982 = vmatmul.mubr.msk.bf16.gmra.mrb[12].mxu0 %vm148_vm0, %v2202_v11  ;;  %2011 = vmatprep.subr.bf16.mxu1 %v2395_v7 }
  0x6c   :  { %2005 = vmatprep.mubr.msk.bf16.mxu0 %vm2396_vm3, %v2395_v7 }
  0x6e   :  { %2012 = vmatpush3.bf16.msra.mxu1 %v2565_v9 }
  0x6f   :  { %2025 = vmatprep.subr.bf16.mxu1 %v2395_v7 }
  0x73   :  { %2006 = vmatmul.mubr.bf16.vlgmr.msra.gmra.mrb[16].mxu0 %v2394_v1 }
  0x74   :  { %2018 = vmatpush3.bf16.msra.mxu0 %v2590_v15  ;;  %2021 = vmatprep.mubr.msk.bf16.mxu0 %vm2396_vm3, %v2395_v7 }
  0x75   :  { %2019 = vmatprep.subr.bf16.mxu0 %v2395_v7 }
  0x78   :  { %2020 = vmatpush3.bf16.msra.mxu0 %v2603_v17 }
  0x79   :  { %2033 = vmatprep.subr.bf16.mxu0 %v2395_v7 }
 0x124   :  { %v1969_v23 = vpop.f32.mrb[0].mxu1 }
 0x125   :  { %v293_v24 = vadd.f32 %v1969_v23, %v1805_v21  ;;  %v284_v25 = vpop.f32.mrb[1].mxu1  ;;  %v1959_v26 = vpop.f32.mrb[0].mxu0 }
 0x126   :  { %v285_v27 = vadd.f32 %v1805_v21, %v284_v25  ;;  %v1970_v28 = vpop.f32.mrb[2].mxu1  ;;  %v204_v29 = vadd.f32 %v1959_v26, %v1795_v22  ;;  %v195_v30 = vpop.f32.mrb[1].mxu0 }
 0x127   :  { %317 = vst.msk [vmem:[#allocation3 + $0x10] sm:$0xff] %vm226_vm6, %v293_v24  ;;  %v296_v31 = vadd.f32 %v1970_v28, %v1805_v21  ;;  %v287_v32 = vpop.f32.mrb[3].mxu1  ;;  %v196_v33 = vadd.f32 %v1795_v22, %v195_v30  ;;  %v1960_v34 = vpop.f32.mrb[2].mxu0 }
 0x128   :  { %315 = vst.msk [vmem:[#allocation3] sm:$0xff] %vm226_vm6, %v285_v27  ;;  %229 = vst.msk [vmem:[#allocation2 + $0x10] sm:$0xff] %vm226_vm6, %v204_v29  ;;  %v288_v35 = vadd.f32 %v1805_v21, %v287_v32  ;;  %v207_v36 = vadd.f32 %v1960_v34, %v1795_v22  ;;  %v198_v37 = vpop.f32.mrb[3].mxu0 }
 0x129   :  { %318 = vst.msk [vmem:[#allocation3 + $0x18] sm:$0xff] %vm226_vm6, %v296_v31  ;;  %227 = vst.msk [vmem:[#allocation2] sm:$0xff] %vm226_vm6, %v196_v33  ;;  %v199_v38 = vadd.f32 %v1795_v22, %v198_v37  ;;  %v2677_v37 = vld [vmem:[%s2865_s11] ss:$0 sm:$0xff] }
 0x12a   :  { %316 = vst.msk [vmem:[#allocation3 + $0x8] sm:$0xff] %vm226_vm6, %v288_v35  ;;  %230 = vst.msk [vmem:[#allocation2 + $0x18] sm:$0xff] %vm226_vm6, %v207_v36 }
 0x12b   :  { %228 = vst.msk [vmem:[#allocation2 + $0x8] sm:$0xff] %vm226_vm6, %v199_v38 }
 0x12c   :  { %v1973_v39 = vpop.f32.mrb[4].mxu1 }
 0x12d   :  { %v309_v40 = vadd.f32 %v1973_v39, %v1805_v21  ;;  %v300_v41 = vpop.f32.mrb[5].mxu1  ;;  %v1963_v42 = vpop.f32.mrb[4].mxu0 }
 0x12e   :  { %v301_v43 = vadd.f32 %v1805_v21, %v300_v41  ;;  %v1974_v44 = vpop.f32.mrb[6].mxu1  ;;  %v220_v45 = vadd.f32 %v1963_v42, %v1795_v22  ;;  %v211_v46 = vpop.f32.mrb[5].mxu0 }
 0x12f   :  { %321 = vst.msk [vmem:[#allocation3 + $0x30] sm:$0xff] %vm226_vm6, %v309_v40  ;;  %v312_v47 = vadd.f32 %v1974_v44, %v1805_v21  ;;  %v303_v48 = vpop.f32.mrb[7].mxu1  ;;  %v212_v49 = vadd.f32 %v1795_v22, %v211_v46  ;;  %v1964_v50 = vpop.f32.mrb[6].mxu0  ;;  %v420_v11 = vld [vmem:[#allocation3] sm:$0xff] }
 0x130   :  { %319 = vst.msk [vmem:[#allocation3 + $0x20] sm:$0xff] %vm226_vm6, %v301_v43  ;;  %v304_v51 = vadd.f32 %v1805_v21, %v303_v48  ;;  %233 = vst.msk [vmem:[#allocation2 + $0x30] sm:$0xff] %vm226_vm6, %v220_v45  ;;  %v223_v52 = vadd.f32 %v1964_v50, %v1795_v22  ;;  %v214_v53 = vpop.f32.mrb[7].mxu0  ;;  %v419_v55 = vld [vmem:[#allocation2] sm:$0xff]  ;;  %v617_v48 = vpop.permute.xlu0 %616 }
 0x131   :  { %322 = vst.msk [vmem:[#allocation3 + $0x38] sm:$0xff] %vm226_vm6, %v312_v47  ;;  %231 = vst.msk [vmem:[#allocation2 + $0x20] sm:$0xff] %vm226_vm6, %v212_v49  ;;  %v215_v54 = vadd.f32 %v1795_v22, %v214_v53  ;;  %vm618_vm7 = vcmp.eq.s32.totalorder %v617_v48, 1  ;;  %v928_v53 = vsel %vm927_vm8, 1, %v2394_v1 }
 0x132   :  { %320 = vst.msk [vmem:[#allocation3 + $0x28] sm:$0xff] %vm226_vm6, %v304_v51  ;;  %234 = vst.msk [vmem:[#allocation2 + $0x38] sm:$0xff] %vm226_vm6, %v223_v52  ;;  %930 = vperm.xlu1 %2195, %v928_v53  }
 0x133   :  { %232 = vst.msk [vmem:[#allocation2 + $0x28] sm:$0xff] %vm226_vm6, %v215_v54  ;;  %v1085_v54 = vsel %vm1084_vm9, 1, %v2394_v1 }
 0x134   :  { %v475_v56 = vpop.f32.mrb[8].mxu1 }
 0x135   :  { %v593_v58 = vadd.f32 %v475_v56, %v419_v55  ;;  %v1991_v59 = vpop.f32.mrb[9].mxu1  ;;  %v1399_v55 = vsel %vm1398_vm10, 1, %v2394_v1  ;;  %v1713_v56 = vsel %vm1712_vm11, 1, %v2394_v1 }
 0x136   :  { %v478_v60 = vpop.f32.mrb[10].mxu1  ;;  %v1979_v61 = vpop.f32.mrb[8].mxu0  ;;  %1087 = vperm.xlu1 %2195, %v1085_v54  }
 0x137   :  { %v1824_v62 = vmul.f32 -1.442695, %v593_v58  ;;  %v1992_v63 = vpop.f32.mrb[11].mxu1  ;;  %v381_v0 = vadd.f32 %v1979_v61, %v1811_v57  ;;  %v372_v2 = vpop.f32.mrb[9].mxu0 }
 0x138   :  { %v373_v3 = vadd.f32 %v1811_v57, %v372_v2  ;;  %v1980_v4 = vpop.f32.mrb[10].mxu0 }
 0x139   :  { %2211 = vpow2.f32 %v1824_v62  ;;  %405 = vst.msk [vmem:[#allocation4 + $0x10] sm:$0xff] %vm226_vm6, %v381_v0  ;;  %v384_v5 = vadd.f32 %v1980_v4, %v1811_v57  ;;  %v375_v8 = vpop.f32.mrb[11].mxu0 }
 0x13a   :  { %403 = vst.msk [vmem:[#allocation4] sm:$0xff] %vm226_vm6, %v373_v3  ;;  %v376_v10 = vadd.f32 %v1811_v57, %v375_v8  ;;  %1401 = vperm.xlu1 %2195, %v1399_v55  }
 0x13b   :  { %406 = vst.msk [vmem:[#allocation4 + $0x18] sm:$0xff] %vm226_vm6, %v384_v5  ;;  %v623_v5 = vld [vmem:[#allocation3 + $0x8] sm:$0xff] }
 0x13c   :  { %v531_v13 = vpop.f32.mrb[12].mxu1  ;;  %404 = vst.msk [vmem:[#allocation4 + $0x8] sm:$0xff] %vm226_vm6, %v376_v10 }
 0x13d   :  { %v600_v14 = vadd.f32 %v531_v13, %v420_v11  ;;  %v1999_v18 = vpop.f32.mrb[13].mxu1 }
 0x13e   :  { %v1983_v20 = vpop.f32.mrb[12].mxu0  ;;  %v534_v21 = vpop.f32.mrb[14].mxu1  ;;  %1715 = vperm.xlu1 %2195, %v1713_v56  }
 0x13f   :  { %v397_v22 = vadd.f32 %v1983_v20, %v1811_v57  ;;  %v388_v23 = vpop.f32.mrb[13].mxu0  ;;  %v2000_v24 = vpop.f32.mrb[15].mxu1  ;;  %v1825_v27 = vmul.f32 -1.442695, %v600_v14 }
 0x140   :  { %v389_v25 = vadd.f32 %v1811_v57, %v388_v23  ;;  %v1984_v26 = vpop.f32.mrb[14].mxu0 }
 0x141   :  { %409 = vst.msk [vmem:[#allocation4 + $0x30] sm:$0xff] %vm226_vm6, %v397_v22  ;;  %v400_v28 = vadd.f32 %v1984_v26, %v1811_v57  ;;  %v391_v29 = vpop.f32.mrb[15].mxu0  ;;  %2213 = vpow2.f32 %v1825_v27  ;;  %v421_v42 = vld [vmem:[#allocation4] sm:$0xff] }
 0x142   :  { %407 = vst.msk [vmem:[#allocation4 + $0x20] sm:$0xff] %vm226_vm6, %v389_v25  ;;  %v392_v30 = vadd.f32 %v1811_v57, %v391_v29  ;;  %v621_v57 = vld [vmem:[#allocation2 + $0x8] sm:$0xff] }
 0x143   :  { %v2212_v31 = vpop.eup %2211  ;;  %410 = vst.msk [vmem:[#allocation4 + $0x38] sm:$0xff] %vm226_vm6, %v400_v28  ;;  %v625_v24 = vld [vmem:[#allocation4 + $0x8] sm:$0xff] }
 0x144   :  { %v597_v32 = vadd.f32 1.0, %v2212_v31  ;;  %408 = vst.msk [vmem:[#allocation4 + $0x28] sm:$0xff] %vm226_vm6, %v392_v30  ;;  %v774_v31 = vpop.permute.xlu0 %773 }
 0x145   :  { %vm775_vm12 = vcmp.eq.s32.totalorder %v774_v31, 1 }
 0x146   :  { %2215 = vrcp.f32 %v597_v32  ;;  %v587_v33 = vpop.f32.mrb[16].mxu0 }
 0x147   :  { %v2007_v34 = vpop.f32.mrb[17].mxu0  ;;  %v588_v38 = vadd.f32 %v2677_v37, %v587_v33 }
 0x148   :  { %v590_v35 = vpop.f32.mrb[18].mxu0 }
 0x149   :  { %v2008_v36 = vpop.f32.mrb[19].mxu0  ;;  %v778_v35 = vld [vmem:[#allocation2 + $0x10] sm:$0xff] }
 0x14b   :  { %v2214_v39 = vpop.eup %2213 }
 0x14c   :  { %v604_v43 = vadd.f32 1.0, %v2214_v39 }
 0x150   :  { %v2216_v40 = vpop.eup %2215 }
 0x151   :  { %v607_v41 = vmul.f32 %v2216_v40, %v588_v38 }
 0x153   :  { %v608_v44 = vadd.f32 %v607_v41, %v421_v42 }
 0x155   :  { %2217 = vtanh.f32 %v608_v44 }
 0x156   :  { %2219 = vrcp.f32 %v604_v43 }
 0x15f   :  { %v2218_v45 = vpop.eup %2217 }
 0x160   :  { %v610_v46 = vsub.f32 0.0, %v2218_v45  ;;  %v2220_v47 = vpop.eup %2219 }
 0x162   :  { %v611_v49 = vmul.f32 %v2220_v47, %v610_v46  ;;  %v780_v47 = vld [vmem:[#allocation3 + $0x10] sm:$0xff] }
 0x164   :  { %v612_v50 = vadd.f32 %v2218_v45, %v611_v49 }
 0x166   :  { %v2680_v51 = vsel %vm618_vm7, %v612_v50, 0.0 }
 0x167   :  { %v626_v52 = vpack.c.bf16 %v2680_v51, %v2680_v51 }
 0x169   :  { %2014 = vmatmul.mubr.msk.bf16.vlgmr.msra.gmra.mrb[16].mxu1 %vm226_vm6, %v626_v52  ;;  %2022 = vmatmul.mubr.msk.bf16.vlgmr.msra.gmra.mrb[20].mxu0 %vm226_vm6, %v626_v52 }
 0x16a   :  { %2026 = vmatpush3.bf16.msra.mxu1 %v2596_v16  ;;  %2029 = vmatprep.mubr.msk.bf16.mxu1 %vm2396_vm3, %v2395_v7 }
 0x16b   :  { %2027 = vmatprep.subr.bf16.mxu1 %v2395_v7  ;;  %2034 = vmatpush3.bf16.msra.mxu0 %v2555_v6 }
 0x16c   :  { %2035 = vmatprep.subr.bf16.mxu0 %v2395_v7  ;;  %2037 = vmatprep.mubr.msk.bf16.mxu0 %vm2396_vm3, %v2395_v7 }
 0x16e   :  { %2028 = vmatpush3.bf16.msra.mxu1 %v2616_v19 }
 0x16f   :  { %2041 = vmatprep.subr.bf16.mxu1 %v2395_v7  ;;  %2036 = vmatpush3.bf16.msra.mxu0 %v2565_v9 }
 0x170   :  { %2049 = vmatprep.subr.bf16.mxu0 %v2395_v7 }
 0x171   :  { %2030 = vmatmul.mubr.msk.bf16.vlgmr.msra.gmra.mrb[20].mxu1 %vm226_vm6, %v626_v52 }
 0x172   :  { %2042 = vmatpush3.bf16.msra.mxu1 %v2590_v15  ;;  %2045 = vmatprep.mubr.msk.bf16.mxu1 %vm2396_vm3, %v2395_v7 }
 0x173   :  { %2043 = vmatprep.subr.bf16.mxu1 %v2395_v7 }
 0x176   :  { %2044 = vmatpush3.bf16.msra.mxu1 %v2603_v17 }
 0x177   :  { %2057 = vmatprep.subr.bf16.mxu1 %v2395_v7 }
 0x23c   :  { %v664_v58 = vpop.f32.mrb[16].mxu1  ;;  %v704_v59 = vpop.f32.mrb[20].mxu0 }
 0x23d   :  { %v750_v60 = vadd.f32 %v664_v58, %v621_v57  ;;  %v2015_v61 = vpop.f32.mrb[17].mxu1  ;;  %v2023_v62 = vpop.f32.mrb[21].mxu0  ;;  %v757_v10 = vadd.f32 %v704_v59, %v623_v5 }
 0x23e   :  { %v667_v63 = vpop.f32.mrb[18].mxu1  ;;  %v707_v0 = vpop.f32.mrb[22].mxu0 }
 0x23f   :  { %v1829_v2 = vmul.f32 -1.442695, %v750_v60  ;;  %v2016_v3 = vpop.f32.mrb[19].mxu1  ;;  %v2024_v4 = vpop.f32.mrb[23].mxu0  ;;  %v1830_v1 = vmul.f32 -1.442695, %v757_v10 }
 0x240   :  { %v782_v60 = vld [vmem:[#allocation4 + $0x10] sm:$0xff]  ;;  %v931_v3 = vpop.permute.xlu1 %930 }
 0x241   :  { %2221 = vpow2.f32 %v1829_v2  ;;  %vm932_vm13 = vcmp.eq.s32.totalorder %v931_v3, 1 }
 0x242   :  { %2223 = vpow2.f32 %v1830_v1 }
 0x244   :  { %v744_v8 = vpop.f32.mrb[20].mxu1 }
 0x245   :  { %v2031_v12 = vpop.f32.mrb[21].mxu1  ;;  %v745_v21 = vadd.f32 %v2677_v37, %v744_v8 }
 0x246   :  { %v747_v11 = vpop.f32.mrb[22].mxu1  ;;  %v935_v12 = vld [vmem:[#allocation2 + $0x18] sm:$0xff] }
 0x247   :  { %v2032_v13 = vpop.f32.mrb[23].mxu1 }
 0x24b   :  { %v2222_v14 = vpop.eup %2221 }
 0x24c   :  { %v754_v18 = vadd.f32 1.0, %v2222_v14  ;;  %v2224_v20 = vpop.eup %2223 }
 0x24d   :  { %v761_v25 = vadd.f32 1.0, %v2224_v20 }
 0x24e   :  { %2225 = vrcp.f32 %v754_v18 }
 0x258   :  { %v2226_v22 = vpop.eup %2225 }
 0x259   :  { %v764_v23 = vmul.f32 %v2226_v22, %v745_v21 }
 0x25b   :  { %v765_v26 = vadd.f32 %v764_v23, %v625_v24 }
 0x25d   :  { %2227 = vtanh.f32 %v765_v26 }
 0x25e   :  { %2229 = vrcp.f32 %v761_v25  ;;  %v937_v25 = vld [vmem:[#allocation3 + $0x18] sm:$0xff] }
 0x267   :  { %v2228_v27 = vpop.eup %2227 }
 0x268   :  { %v767_v28 = vsub.f32 %v2680_v51, %v2228_v27  ;;  %v2230_v29 = vpop.eup %2229 }
 0x26a   :  { %v768_v30 = vmul.f32 %v2230_v29, %v767_v28 }
 0x26c   :  { %v769_v32 = vadd.f32 %v2228_v27, %v768_v30 }
 0x26e   :  { %v776_v33 = vsel %vm775_vm12, %v769_v32, %v2680_v51 }
 0x26f   :  { %v783_v34 = vpack.c.bf16 %v776_v33, %v776_v33 }
 0x271   :  { %2038 = vmatmul.mubr.msk.bf16.vlgmr.msra.gmra.mrb[24].mxu0 %vm226_vm6, %v783_v34  ;;  %2046 = vmatmul.mubr.msk.bf16.vlgmr.msra.gmra.mrb[24].mxu1 %vm226_vm6, %v783_v34 }
 0x272   :  { %2050 = vmatpush3.bf16.msra.mxu0 %v2596_v16  ;;  %2053 = vmatprep.mubr.msk.bf16.mxu0 %vm2396_vm3, %v2395_v7 }
 0x273   :  { %2051 = vmatprep.subr.bf16.mxu0 %v2395_v7  ;;  %2058 = vmatpush3.bf16.msra.mxu1 %v2555_v6 }
 0x274   :  { %2059 = vmatprep.subr.bf16.mxu1 %v2395_v7  ;;  %2061 = vmatprep.mubr.msk.bf16.mxu1 %vm2396_vm3, %v2395_v7 }
 0x276   :  { %2052 = vmatpush3.bf16.msra.mxu0 %v2616_v19 }
 0x277   :  { %2065 = vmatprep.subr.bf16.mxu0 %v2395_v7  ;;  %2060 = vmatpush3.bf16.msra.mxu1 %v2565_v9 }
 0x278   :  { %2073 = vmatprep.subr.bf16.mxu1 %v2395_v7 }
 0x279   :  { %2054 = vmatmul.mubr.msk.bf16.vlgmr.msra.gmra.mrb[28].mxu0 %vm226_vm6, %v783_v34 }
 0x27a   :  { %2066 = vmatpush3.bf16.msra.mxu0 %v2590_v15  ;;  %2069 = vmatprep.mubr.msk.bf16.mxu0 %vm2396_vm3, %v2395_v7 }
 0x27b   :  { %2067 = vmatprep.subr.bf16.mxu0 %v2395_v7 }
 0x27e   :  { %2068 = vmatpush3.bf16.msra.mxu0 %v2603_v17 }
 0x27f   :  { %2081 = vmatprep.subr.bf16.mxu0 %v2395_v7 }
 0x344   :  { %v821_v36 = vpop.f32.mrb[24].mxu0  ;;  %v861_v38 = vpop.f32.mrb[24].mxu1 }
 0x345   :  { %v907_v39 = vadd.f32 %v821_v36, %v778_v35  ;;  %v2039_v40 = vpop.f32.mrb[25].mxu0  ;;  %v2047_v41 = vpop.f32.mrb[25].mxu1  ;;  %v914_v49 = vadd.f32 %v861_v38, %v780_v47 }
 0x346   :  { %v824_v42 = vpop.f32.mrb[26].mxu0  ;;  %v864_v43 = vpop.f32.mrb[26].mxu1 }
 0x347   :  { %v1834_v44 = vmul.f32 -1.442695, %v907_v39  ;;  %v2040_v45 = vpop.f32.mrb[27].mxu0  ;;  %v2048_v46 = vpop.f32.mrb[27].mxu1  ;;  %v1835_v53 = vmul.f32 -1.442695, %v914_v49 }
 0x348   :  { %v939_v39 = vld [vmem:[#allocation4 + $0x18] sm:$0xff]  ;;  %v1088_v46 = vpop.permute.xlu1 %1087 }
 0x349   :  { %2231 = vpow2.f32 %v1834_v44  ;;  %vm1089_vm14 = vcmp.eq.s32.totalorder %v1088_v46, 1 }
 0x34a   :  { %2233 = vpow2.f32 %v1835_v53 }
 0x34c   :  { %v901_v48 = vpop.f32.mrb[28].mxu0 }
 0x34d   :  { %v2055_v50 = vpop.f32.mrb[29].mxu0  ;;  %v902_v57 = vadd.f32 %v2677_v37, %v901_v48 }
 0x34e   :  { %v904_v51 = vpop.f32.mrb[30].mxu0  ;;  %v1092_v50 = vld [vmem:[#allocation2 + $0x20] sm:$0xff] }
 0x34f   :  { %v2056_v52 = vpop.f32.mrb[31].mxu0 }
 0x353   :  { %v2232_v54 = vpop.eup %2231 }
 0x354   :  { %v911_v55 = vadd.f32 1.0, %v2232_v54  ;;  %v2234_v56 = vpop.eup %2233 }
 0x355   :  { %v918_v61 = vadd.f32 1.0, %v2234_v56 }
 0x356   :  { %2235 = vrcp.f32 %v911_v55 }
 0x360   :  { %v2236_v58 = vpop.eup %2235 }
 0x361   :  { %v921_v59 = vmul.f32 %v2236_v58, %v902_v57 }
 0x363   :  { %v922_v62 = vadd.f32 %v921_v59, %v782_v60 }
 0x365   :  { %2237 = vtanh.f32 %v922_v62 }
 0x366   :  { %2239 = vrcp.f32 %v918_v61  ;;  %v1094_v61 = vld [vmem:[#allocation3 + $0x20] sm:$0xff] }
 0x36f   :  { %v2238_v63 = vpop.eup %2237 }
 0x370   :  { %v924_v0 = vsub.f32 %v776_v33, %v2238_v63  ;;  %v2240_v2 = vpop.eup %2239 }
 0x372   :  { %v925_v4 = vmul.f32 %v2240_v2, %v924_v0 }
 0x374   :  { %v926_v5 = vadd.f32 %v2238_v63, %v925_v4 }
 0x376   :  { %v933_v8 = vsel %vm932_vm13, %v926_v5, %v776_v33 }
 0x377   :  { %v940_v10 = vpack.c.bf16 %v933_v8, %v933_v8 }
 0x379   :  { %2062 = vmatmul.mubr.msk.bf16.vlgmr.msra.gmra.mrb[28].mxu1 %vm226_vm6, %v940_v10  ;;  %2070 = vmatmul.mubr.msk.bf16.vlgmr.msra.gmra.mrb[32].mxu0 %vm226_vm6, %v940_v10 }
 0x37a   :  { %2074 = vmatpush3.bf16.msra.mxu1 %v2596_v16  ;;  %2077 = vmatprep.mubr.msk.bf16.mxu1 %vm2396_vm3, %v2395_v7 }
 0x37b   :  { %2075 = vmatprep.subr.bf16.mxu1 %v2395_v7  ;;  %2082 = vmatpush3.bf16.msra.mxu0 %v2555_v6 }
 0x37c   :  { %2083 = vmatprep.subr.bf16.mxu0 %v2395_v7  ;;  %2085 = vmatprep.mubr.msk.bf16.mxu0 %vm2396_vm3, %v2395_v7 }
 0x37e   :  { %2076 = vmatpush3.bf16.msra.mxu1 %v2616_v19 }
 0x37f   :  { %2089 = vmatprep.subr.bf16.mxu1 %v2395_v7  ;;  %2084 = vmatpush3.bf16.msra.mxu0 %v2565_v9 }
 0x380   :  { %2097 = vmatprep.subr.bf16.mxu0 %v2395_v7 }
 0x381   :  { %2078 = vmatmul.mubr.msk.bf16.vlgmr.msra.gmra.mrb[32].mxu1 %vm226_vm6, %v940_v10 }
 0x382   :  { %2090 = vmatpush3.bf16.msra.mxu1 %v2590_v15  ;;  %2093 = vmatprep.mubr.msk.bf16.mxu1 %vm2396_vm3, %v2395_v7 }
 0x383   :  { %2091 = vmatprep.subr.bf16.mxu1 %v2395_v7 }
 0x386   :  { %2092 = vmatpush3.bf16.msra.mxu1 %v2603_v17 }
 0x387   :  { %2105 = vmatprep.subr.bf16.mxu1 %v2395_v7 }
 0x44c   :  { %v978_v11 = vpop.f32.mrb[28].mxu1  ;;  %v1018_v13 = vpop.f32.mrb[32].mxu0 }
 0x44d   :  { %v1064_v1 = vadd.f32 %v978_v11, %v935_v12  ;;  %v2063_v14 = vpop.f32.mrb[29].mxu1  ;;  %v2071_v18 = vpop.f32.mrb[33].mxu0  ;;  %v1071_v27 = vadd.f32 %v1018_v13, %v937_v25 }
 0x44e   :  { %v981_v20 = vpop.f32.mrb[30].mxu1  ;;  %v1021_v21 = vpop.f32.mrb[34].mxu0 }
 0x44f   :  { %v1839_v22 = vmul.f32 -1.442695, %v1064_v1  ;;  %v2064_v23 = vpop.f32.mrb[31].mxu1  ;;  %v2072_v24 = vpop.f32.mrb[35].mxu0  ;;  %v1840_v31 = vmul.f32 -1.442695, %v1071_v27 }
 0x450   :  { %v1096_v1 = vld [vmem:[#allocation4 + $0x20] sm:$0xff]  ;;  %v1245_v24 = vpop.permute.xlu0 %1244 }
 0x451   :  { %2241 = vpow2.f32 %v1839_v22  ;;  %vm1246_vm15 = vcmp.eq.s32.totalorder %v1245_v24, 1 }
 0x452   :  { %2243 = vpow2.f32 %v1840_v31 }
 0x454   :  { %v1058_v26 = vpop.f32.mrb[32].mxu1 }
 0x455   :  { %v2079_v28 = vpop.f32.mrb[33].mxu1  ;;  %v1059_v35 = vadd.f32 %v2677_v37, %v1058_v26 }
 0x456   :  { %v1061_v29 = vpop.f32.mrb[34].mxu1 }
 0x457   :  { %v2080_v30 = vpop.f32.mrb[35].mxu1 }
 0x45b   :  { %v2242_v32 = vpop.eup %2241 }
 0x45c   :  { %v1068_v33 = vadd.f32 1.0, %v2242_v32  ;;  %v2244_v34 = vpop.eup %2243 }
 0x45d   :  { %v1075_v40 = vadd.f32 1.0, %v2244_v34 }
 0x45e   :  { %2245 = vrcp.f32 %v1068_v33 }
 0x468   :  { %v2246_v36 = vpop.eup %2245 }
 0x469   :  { %v1078_v38 = vmul.f32 %v2246_v36, %v1059_v35 }
 0x46b   :  { %v1079_v41 = vadd.f32 %v1078_v38, %v939_v39  ;;  %v1251_v39 = vld [vmem:[#allocation3 + $0x28] sm:$0xff] }
 0x46d   :  { %2247 = vtanh.f32 %v1079_v41 }
 0x46e   :  { %2249 = vrcp.f32 %v1075_v40 }
 0x477   :  { %v2248_v42 = vpop.eup %2247 }
 0x478   :  { %v1081_v43 = vsub.f32 %v933_v8, %v2248_v42  ;;  %v2250_v44 = vpop.eup %2249 }
 0x47a   :  { %v1082_v45 = vmul.f32 %v2250_v44, %v1081_v43 }
 0x47c   :  { %v1083_v47 = vadd.f32 %v2248_v42, %v1082_v45 }
 0x47e   :  { %v1090_v48 = vsel %vm1089_vm14, %v1083_v47, %v933_v8 }
 0x47f   :  { %v1097_v49 = vpack.c.bf16 %v1090_v48, %v1090_v48 }
 0x481   :  { %2086 = vmatmul.mubr.msk.bf16.vlgmr.msra.gmra.mrb[36].mxu0 %vm226_vm6, %v1097_v49  ;;  %2094 = vmatmul.mubr.msk.bf16.vlgmr.msra.gmra.mrb[36].mxu1 %vm226_vm6, %v1097_v49 }
 0x482   :  { %2098 = vmatpush3.bf16.msra.mxu0 %v2596_v16  ;;  %2101 = vmatprep.mubr.msk.bf16.mxu0 %vm2396_vm3, %v2395_v7 }
 0x483   :  { %2099 = vmatprep.subr.bf16.mxu0 %v2395_v7  ;;  %2106 = vmatpush3.bf16.msra.mxu1 %v2555_v6 }
 0x484   :  { %2107 = vmatprep.subr.bf16.mxu1 %v2395_v7  ;;  %2109 = vmatprep.mubr.msk.bf16.mxu1 %vm2396_vm3, %v2395_v7 }
 0x486   :  { %2100 = vmatpush3.bf16.msra.mxu0 %v2616_v19 }
 0x487   :  { %2113 = vmatprep.subr.bf16.mxu0 %v2395_v7  ;;  %2108 = vmatpush3.bf16.msra.mxu1 %v2565_v9 }
 0x488   :  { %2121 = vmatprep.subr.bf16.mxu1 %v2395_v7 }
 0x489   :  { %2102 = vmatmul.mubr.msk.bf16.vlgmr.msra.gmra.mrb[40].mxu0 %vm226_vm6, %v1097_v49 }
 0x48a   :  { %2114 = vmatpush3.bf16.msra.mxu0 %v2590_v15  ;;  %2117 = vmatprep.mubr.msk.bf16.mxu0 %vm2396_vm3, %v2395_v7 }
 0x48b   :  { %2115 = vmatprep.subr.bf16.mxu0 %v2395_v7 }
 0x48e   :  { %2116 = vmatpush3.bf16.msra.mxu0 %v2603_v17 }
 0x48f   :  { %2129 = vmatprep.subr.bf16.mxu0 %v2395_v7 }
 0x554   :  { %v1135_v51 = vpop.f32.mrb[36].mxu0  ;;  %v1175_v52 = vpop.f32.mrb[36].mxu1 }
 0x555   :  { %v1221_v53 = vadd.f32 %v1135_v51, %v1092_v50  ;;  %v2087_v54 = vpop.f32.mrb[37].mxu0  ;;  %v2095_v55 = vpop.f32.mrb[37].mxu1  ;;  %v1228_v63 = vadd.f32 %v1175_v52, %v1094_v61  ;;  %v1253_v52 = vld [vmem:[#allocation4 + $0x28] sm:$0xff] }
 0x556   :  { %v1138_v56 = vpop.f32.mrb[38].mxu0  ;;  %v1178_v57 = vpop.f32.mrb[38].mxu1 }
 0x557   :  { %v1844_v58 = vmul.f32 -1.442695, %v1221_v53  ;;  %v2088_v59 = vpop.f32.mrb[39].mxu0  ;;  %v2096_v60 = vpop.f32.mrb[39].mxu1  ;;  %v1845_v4 = vmul.f32 -1.442695, %v1228_v63 }
 0x558   :  { %v1402_v59 = vpop.permute.xlu1 %1401  ;;  %v2291_v63 = vld [vmem:[%s2859_s5] sm:$0xff]  }
 0x559   :  { %2251 = vpow2.f32 %v1844_v58  ;;  %vm1403_vm0 = vcmp.eq.s32.totalorder %v1402_v59, 1 }
 0x55a   :  { %2253 = vpow2.f32 %v1845_v4 }
 0x55c   :  { %v1215_v62 = vpop.f32.mrb[40].mxu0 }
 0x55d   :  { %v2103_v0 = vpop.f32.mrb[41].mxu0  ;;  %v1216_v12 = vadd.f32 %v2677_v37, %v1215_v62 }
 0x55e   :  { %v1218_v2 = vpop.f32.mrb[42].mxu0 }
 0x55f   :  { %v2104_v3 = vpop.f32.mrb[43].mxu0 }
 0x563   :  { %v2252_v5 = vpop.eup %2251 }
 0x564   :  { %v1225_v8 = vadd.f32 1.0, %v2252_v5  ;;  %v2254_v10 = vpop.eup %2253 }
 0x565   :  { %v1232_v14 = vadd.f32 1.0, %v2254_v10 }
 0x566   :  { %2255 = vrcp.f32 %v1225_v8 }
 0x570   :  { %v2256_v11 = vpop.eup %2255 }
 0x571   :  { %v1235_v13 = vmul.f32 %v2256_v11, %v1216_v12  ;;  %v1408_v12 = vld [vmem:[#allocation3 + $0x30] sm:$0xff] }
 0x573   :  { %v1236_v18 = vadd.f32 %v1235_v13, %v1096_v1 }
 0x575   :  { %2257 = vtanh.f32 %v1236_v18 }
 0x576   :  { %2259 = vrcp.f32 %v1232_v14 }
 0x57f   :  { %v2258_v20 = vpop.eup %2257 }
 0x580   :  { %v1238_v21 = vsub.f32 %v1090_v48, %v2258_v20  ;;  %v2260_v22 = vpop.eup %2259 }
 0x582   :  { %v1239_v23 = vmul.f32 %v2260_v22, %v1238_v21 }
 0x584   :  { %v1240_v25 = vadd.f32 %v2258_v20, %v1239_v23 }
 0x586   :  { %v1247_v26 = vsel %vm1246_vm15, %v1240_v25, %v1090_v48 }
 0x587   :  { %v1254_v27 = vpack.c.bf16 %v1247_v26, %v1247_v26 }
 0x589   :  { %2110 = vmatmul.mubr.msk.bf16.vlgmr.msra.gmra.mrb[40].mxu1 %vm226_vm6, %v1254_v27  ;;  %2118 = vmatmul.mubr.msk.bf16.vlgmr.msra.gmra.mrb[44].mxu0 %vm226_vm6, %v1254_v27 }
 0x58a   :  { %2122 = vmatpush3.bf16.msra.mxu1 %v2596_v16  ;;  %2125 = vmatprep.mubr.msk.bf16.mxu1 %vm2396_vm3, %v2395_v7 }
 0x58b   :  { %2123 = vmatprep.subr.bf16.mxu1 %v2395_v7  ;;  %2130 = vmatpush3.bf16.msra.mxu0 %v2555_v6  ;;  %v1249_v6 = vld [vmem:[#allocation2 + $0x28] sm:$0xff] }
 0x58c   :  { %2131 = vmatprep.subr.bf16.mxu0 %v2395_v7  ;;  %2133 = vmatprep.mubr.msk.bf16.mxu0 %vm2396_vm3, %v2395_v7 }
 0x58e   :  { %2124 = vmatpush3.bf16.msra.mxu1 %v2616_v19 }
 0x58f   :  { %2137 = vmatprep.subr.bf16.mxu1 %v2395_v7  ;;  %2132 = vmatpush3.bf16.msra.mxu0 %v2565_v9 }
 0x590   :  { %2145 = vmatprep.subr.bf16.mxu0 %v2395_v7 }
 0x591   :  { %2126 = vmatmul.mubr.msk.bf16.vlgmr.msra.gmra.mrb[44].mxu1 %vm226_vm6, %v1254_v27 }
 0x592   :  { %2138 = vmatpush3.bf16.msra.mxu1 %v2590_v15  ;;  %2141 = vmatprep.mubr.msk.bf16.mxu1 %vm2396_vm3, %v2395_v7 }
 0x593   :  { %2139 = vmatprep.subr.bf16.mxu1 %v2395_v7 }
 0x596   :  { %2140 = vmatpush3.bf16.msra.mxu1 %v2603_v17 }
 0x597   :  { %2153 = vmatprep.subr.bf16.mxu1 %v2395_v7 }
 0x65c   :  { %v1292_v28 = vpop.f32.mrb[40].mxu1  ;;  %v1332_v29 = vpop.f32.mrb[44].mxu0 }
 0x65d   :  { %v1378_v30 = vadd.f32 %v1292_v28, %v1249_v6  ;;  %v2111_v31 = vpop.f32.mrb[41].mxu1  ;;  %v2119_v32 = vpop.f32.mrb[45].mxu0  ;;  %v1385_v41 = vadd.f32 %v1332_v29, %v1251_v39  ;;  %v2209_v39 = vld [vmem:[%s2866_s12] sm:$0xff]  }
 0x65e   :  { %v1295_v33 = vpop.f32.mrb[42].mxu1  ;;  %v1335_v34 = vpop.f32.mrb[46].mxu0 }
 0x65f   :  { %v1849_v35 = vmul.f32 -1.442695, %v1378_v30  ;;  %v2112_v36 = vpop.f32.mrb[43].mxu1  ;;  %v2120_v38 = vpop.f32.mrb[47].mxu0  ;;  %v1850_v45 = vmul.f32 -1.442695, %v1385_v41 }
 0x660   :  { %v1559_v31 = vpop.permute.xlu0 %1558  ;;  %v2292_v36 = vld [vmem:[%s2861_s7] sm:$0xff]   ;;  %v2293_v38 = vld [vmem:[%s2861_s7 + $0x8] sm:$0xff]   ;;  %v1563_v41 = vld [vmem:[#allocation2 + $0x38] sm:$0xff] }
 0x661   :  { %2261 = vpow2.f32 %v1849_v35  ;;  %vm1560_vm1 = vcmp.eq.s32.totalorder %v1559_v31, 1 }
 0x662   :  { %2263 = vpow2.f32 %v1850_v45 }
 0x664   :  { %v1372_v40 = vpop.f32.mrb[44].mxu1 }
 0x665   :  { %v2127_v42 = vpop.f32.mrb[45].mxu1  ;;  %v1373_v49 = vadd.f32 %v2677_v37, %v1372_v40  ;;  %v2210_v40 = vld [vmem:[%s2866_s12 + $0x8] sm:$0xff]  }
 0x666   :  { %v1375_v43 = vpop.f32.mrb[46].mxu1 }
 0x667   :  { %v2128_v44 = vpop.f32.mrb[47].mxu1 }
 0x66b   :  { %v2262_v46 = vpop.eup %2261 }
 0x66c   :  { %v1382_v47 = vadd.f32 1.0, %v2262_v46  ;;  %v2264_v48 = vpop.eup %2263 }
 0x66d   :  { %v1389_v53 = vadd.f32 1.0, %v2264_v48 }
 0x66e   :  { %2265 = vrcp.f32 %v1382_v47 }
 0x678   :  { %v2266_v50 = vpop.eup %2265 }
 0x679   :  { %v1392_v51 = vmul.f32 %v2266_v50, %v1373_v49 }
 0x67b   :  { %v1393_v54 = vadd.f32 %v1392_v51, %v1253_v52  ;;  %v1565_v52 = vld [vmem:[#allocation3 + $0x38] sm:$0xff] }
 0x67d   :  { %2267 = vtanh.f32 %v1393_v54 }
 0x67e   :  { %2269 = vrcp.f32 %v1389_v53 }
 0x687   :  { %v2268_v55 = vpop.eup %2267 }
 0x688   :  { %v1395_v56 = vsub.f32 %v1247_v26, %v2268_v55  ;;  %v2270_v57 = vpop.eup %2269 }
 0x68a   :  { %v1396_v58 = vmul.f32 %v2270_v57, %v1395_v56 }
 0x68c   :  { %v1397_v60 = vadd.f32 %v2268_v55, %v1396_v58 }
 0x68e   :  { %v1404_v61 = vsel %vm1403_vm0, %v1397_v60, %v1247_v26  ;;  %v1410_v26 = vld [vmem:[#allocation4 + $0x30] sm:$0xff] }
 0x68f   :  { %v1411_v62 = vpack.c.bf16 %v1404_v61, %v1404_v61 }
 0x691   :  { %2134 = vmatmul.mubr.msk.bf16.vlgmr.msra.gmra.mrb[48].mxu0 %vm226_vm6, %v1411_v62  ;;  %2142 = vmatmul.mubr.msk.bf16.vlgmr.msra.gmra.mrb[48].mxu1 %vm226_vm6, %v1411_v62 }
 0x692   :  { %2146 = vmatpush3.bf16.msra.mxu0 %v2596_v16  ;;  %2149 = vmatprep.mubr.msk.bf16.mxu0 %vm2396_vm3, %v2395_v7  ;;  %v1406_v16 = vld [vmem:[#allocation2 + $0x30] sm:$0xff] }
 0x693   :  { %2147 = vmatprep.subr.bf16.mxu0 %v2395_v7  ;;  %2154 = vmatpush3.bf16.msra.mxu1 %v2291_v63 }
 0x694   :  { %2155 = vmatprep.subr.bf16.mxu1 %v2395_v7  ;;  %2157 = vmatprep.mubr.msk.bf16.mxu1 %vm2396_vm3, %v2395_v7 }
 0x696   :  { %2148 = vmatpush3.bf16.msra.mxu0 %v2616_v19 }
 0x697   :  { %2161 = vmatprep.subr.bf16.mxu0 %v2395_v7  ;;  %2156 = vmatpush3.bf16.msra.mxu1 %v2565_v9 }
 0x698   :  { %2169 = vmatprep.subr.bf16.mxu1 %v2395_v7 }
 0x699   :  { %2150 = vmatmul.mubr.msk.bf16.vlgmr.msra.gmra.mrb[52].mxu0 %vm226_vm6, %v1411_v62 }
 0x69a   :  { %2162 = vmatpush3.bf16.msra.mxu0 %v2590_v15  ;;  %2165 = vmatprep.mubr.msk.bf16.mxu0 %vm2396_vm3, %v2395_v7 }
 0x69b   :  { %2163 = vmatprep.subr.bf16.mxu0 %v2395_v7 }
 0x69e   :  { %2164 = vmatpush3.bf16.msra.mxu0 %v2603_v17 }
 0x69f   :  { %2177 = vmatprep.subr.bf16.mxu0 %v2395_v7 }
 0x764   :  { %v1449_v19 = vpop.f32.mrb[48].mxu0  ;;  %v1489_v0 = vpop.f32.mrb[48].mxu1 }
 0x765   :  { %v1535_v2 = vadd.f32 %v1449_v19, %v1406_v16  ;;  %v2135_v9 = vpop.f32.mrb[49].mxu0  ;;  %v2143_v3 = vpop.f32.mrb[49].mxu1  ;;  %v1542_v13 = vadd.f32 %v1489_v0, %v1408_v12  ;;  %v1567_v16 = vld [vmem:[#allocation4 + $0x38] sm:$0xff]  ;;  %v1861_v12 = vld [vmem:[#allocation5] ss:$0 sm:$0xff] }
 0x766   :  { %v1452_v4 = vpop.f32.mrb[50].mxu0  ;;  %v1492_v5 = vpop.f32.mrb[50].mxu1 }
 0x767   :  { %v1854_v8 = vmul.f32 -1.442695, %v1535_v2  ;;  %v2136_v10 = vpop.f32.mrb[51].mxu0  ;;  %v2144_v15 = vpop.f32.mrb[51].mxu1  ;;  %v1855_v18 = vmul.f32 -1.442695, %v1542_v13 }
 0x768   :  { %v1716_v4 = vpop.permute.xlu1 %1715 }
 0x769   :  { %2271 = vpow2.f32 %v1854_v8  ;;  %vm1717_vm2 = vcmp.eq.s32.totalorder %v1716_v4, 1 }
 0x76a   :  { %2273 = vpow2.f32 %v1855_v18 }
 0x76c   :  { %v1529_v11 = vpop.f32.mrb[52].mxu0 }
 0x76d   :  { %v2151_v1 = vpop.f32.mrb[53].mxu0  ;;  %v1530_v23 = vadd.f32 %v2677_v37, %v1529_v11 }
 0x76e   :  { %v1532_v14 = vpop.f32.mrb[54].mxu0 }
 0x76f   :  { %v2152_v17 = vpop.f32.mrb[55].mxu0 }
 0x773   :  { %v2272_v20 = vpop.eup %2271 }
 0x774   :  { %v1539_v21 = vadd.f32 1.0, %v2272_v20  ;;  %v2274_v22 = vpop.eup %2273 }
 0x775   :  { %v1546_v27 = vadd.f32 1.0, %v2274_v22 }
 0x776   :  { %2275 = vrcp.f32 %v1539_v21 }
 0x780   :  { %v2276_v24 = vpop.eup %2275 }
 0x781   :  { %v1549_v25 = vmul.f32 %v2276_v24, %v1530_v23 }
 0x783   :  { %v1550_v6 = vadd.f32 %v1549_v25, %v1410_v26 }
 0x785   :  { %2277 = vtanh.f32 %v1550_v6 }
 0x786   :  { %2279 = vrcp.f32 %v1546_v27 }
 0x78f   :  { %v2278_v28 = vpop.eup %2277 }
 0x790   :  { %v1552_v29 = vsub.f32 %v1404_v61, %v2278_v28  ;;  %v2280_v30 = vpop.eup %2279 }
 0x792   :  { %v1553_v32 = vmul.f32 %v2280_v30, %v1552_v29 }
 0x794   :  { %v1554_v33 = vadd.f32 %v2278_v28, %v1553_v32 }
 0x796   :  { %v1561_v34 = vsel %vm1560_vm1, %v1554_v33, %v1404_v61 }
 0x797   :  { %v1568_v35 = vpack.c.bf16 %v1561_v34, %v1561_v34 }
 0x799   :  { %2158 = vmatmul.mubr.msk.bf16.vlgmr.msra.gmra.mrb[52].mxu1 %vm226_vm6, %v1568_v35  ;;  %2166 = vmatmul.mubr.msk.bf16.vlgmr.msra.gmra.mrb[56].mxu0 %vm226_vm6, %v1568_v35 }
 0x79a   :  { %2170 = vmatpush3.bf16.msra.mxu1 %v2292_v36  ;;  %2173 = vmatprep.mubr.msk.bf16.mxu1 %vm2396_vm3, %v2395_v7 }
 0x79b   :  { %2171 = vmatprep.subr.bf16.mxu1 %v2395_v7  ;;  %2181 = vmatprep.mubr.msk.bf16.mxu0 %vm2396_vm3, %v2395_v7  ;;  %vm1786_vm3 = vcmask 7168  }
 0x79c   :  { %2178 = vmatpush3.bf16.msra.mxu0 %v2209_v39 }
 0x79d   :  { %2179 = vmatprep.subr.bf16.mxu0 %v2395_v7 }
 0x79e   :  { %2172 = vmatpush3.bf16.msra.mxu1 %v2293_v38 }
 0x7a0   :  { %2180 = vmatpush3.bf16.msra.mxu0 %v2210_v40 }
 0x7a1   :  { %2174 = vmatmul.mubr.msk.bf16.vlgmr.msra.gmra.mrb[56].mxu1 %vm226_vm6, %v1568_v35 }
 0x86c   :  { %v1606_v42 = vpop.f32.mrb[52].mxu1  ;;  %v1646_v43 = vpop.f32.mrb[56].mxu0 }
 0x86d   :  { %v1692_v44 = vadd.f32 %v1606_v42, %v1563_v41  ;;  %v2159_v45 = vpop.f32.mrb[53].mxu1  ;;  %v2167_v46 = vpop.f32.mrb[57].mxu0  ;;  %v1699_v7 = vadd.f32 %v1646_v43, %v1565_v52 }
 0x86e   :  { %v1609_v47 = vpop.f32.mrb[54].mxu1  ;;  %v1649_v48 = vpop.f32.mrb[58].mxu0 }
 0x86f   :  { %v1859_v49 = vmul.f32 -1.442695, %v1692_v44  ;;  %v2160_v50 = vpop.f32.mrb[55].mxu1  ;;  %v2168_v51 = vpop.f32.mrb[59].mxu0  ;;  %v1860_v57 = vmul.f32 -1.442695, %v1699_v7 }
 0x871   :  { %2281 = vpow2.f32 %v1859_v49 }
 0x872   :  { %2283 = vpow2.f32 %v1860_v57 }
 0x874   :  { %v1686_v53 = vpop.f32.mrb[56].mxu1 }
 0x875   :  { %v2175_v54 = vpop.f32.mrb[57].mxu1  ;;  %v1687_v61 = vadd.f32 %v2677_v37, %v1686_v53 }
 0x876   :  { %v1689_v55 = vpop.f32.mrb[58].mxu1 }
 0x877   :  { %v2176_v56 = vpop.f32.mrb[59].mxu1 }
 0x87b   :  { %v2282_v58 = vpop.eup %2281 }
 0x87c   :  { %v1696_v59 = vadd.f32 1.0, %v2282_v58  ;;  %v2284_v60 = vpop.eup %2283 }
 0x87d   :  { %v1703_v19 = vadd.f32 1.0, %v2284_v60 }
 0x87e   :  { %2285 = vrcp.f32 %v1696_v59 }
 0x888   :  { %v2286_v62 = vpop.eup %2285 }
 0x889   :  { %v1706_v63 = vmul.f32 %v2286_v62, %v1687_v61 }
 0x88b   :  { %v1707_v0 = vadd.f32 %v1706_v63, %v1567_v16 }
 0x88d   :  { %2287 = vtanh.f32 %v1707_v0 }
 0x88e   :  { %2289 = vrcp.f32 %v1703_v19 }
 0x897   :  { %v2288_v2 = vpop.eup %2287 }
 0x898   :  { %v1709_v9 = vsub.f32 %v1561_v34, %v2288_v2  ;;  %v2290_v3 = vpop.eup %2289 }
 0x89a   :  { %v1710_v5 = vmul.f32 %v2290_v3, %v1709_v9 }
 0x89c   :  { %v1711_v8 = vadd.f32 %v2288_v2, %v1710_v5 }
 0x89e   :  { %v1718_v10 = vsel %vm1717_vm2, %v1711_v8, %v1561_v34 }
 0x89f   :  { %v1719_v15 = vpack.c.bf16 %v1718_v10, %v1718_v10 }
 0x8a1   :  { %2182 = vmatmul.mubr.msk.bf16.vlgmr.msra.gmra.mrb[60].mxu0 %vm226_vm6, %v1719_v15 }
 0x974   :  { %v1780_v37 = vpop.f32.mrb[60].mxu0 }
 0x975   :  { %v1781_v11 = vadd.f32 %v1861_v12, %v1780_v37  ;;  %v2183_v13 = vpop.f32.mrb[61].mxu0 }
 0x976   :  { %v1783_v1 = vpop.f32.mrb[62].mxu0 }
 0x977   :  { %1787 = vst.msk [vmem:[%s2868_s14] sm:$0xff] %vm1786_vm3, %v1781_v11  ;;  %v2184_v14 = vpop.f32.mrb[63].mxu0 }
 0x978   :  { %1792 = vsyncpa [#allocation7], 1 }
 0x979   :  { %1793 = vsyncpa [#allocation9], 1 }
 0x97a   :  { %1794 = vsyncpa [#allocation12], 1 }

</bundles_post_ra>
